<compile_context>
chip_gen: v5e
topology: v5e:2x2
jax: 0.10.0
libtpu: 0.0.40
codegen_flags: <defaults>
</compile_context>

<pallas_src>
import functools

import jax
import jax.numpy as jnp
from jax import lax
from jax.experimental import pallas as pl
from jax.experimental.pallas import tpu as pltpu

E = 32          # embedding_size
N_POINTS = 128  # points per cloud (small stand-in for pcd_num=4096)
FEAT_C = 256    # l0_points channels produced by fp1 (mlp=[128,128,256])
AUX_COLS = 16   # packed aux operand lane count (pads to 128 in VMEM anyway)


# ----------------------------- Pallas kernels -----------------------------

def _encoder_kernel(xT_ref, aux_ref, w1_ref, w2_ref, *refs, emit_full):
    """Tiled, two-pass encoder head in transposed (channels, points) layout.

    grid = (2, n_point_tiles); axis 0 is the pass, axis 1 the point tile.
    xT_ref : (4, tile)        input point features (transposed), per tile
    aux_ref: (256, 16)        packed: cols 0:4 w_fp (out,in), col4 b_fp,
                              rows[:E] of cols 5..9 = b_out, bn_gamma, bn_beta,
                              b_out2, row-mean(w_out2); [0,10] = mean(b_out2)
    w1_ref : (E, 256) bf16    Conv1d(256, E, 1).weight (kernel dim squeezed)
    w2_ref : (E, E)   bf16    Conv1d(E, E, 1).weight
    outputs: [emb (E, tile) if emit_full] + mean (1, tile)   (lane-dense stores)
    scratch: z_buf (E, B*N) f32 (persists across the grid), s_sum/s_sq (E,1) f32
    """
    if emit_full:
        emb_ref, mean_ref, z_buf, s_sum, s_sq = refs
    else:
        mean_ref, z_buf, s_sum, s_sq = refs

    p = pl.program_id(0)          # 0: compute z + accumulate BN stats, 1: finalize
    i = pl.program_id(1)          # point tile index
    tile = xT_ref.shape[1]
    start = pl.multiple_of(i * tile, 128)
    n_total = z_buf.shape[1]      # B*N (static)

    @pl.when((p == 0) & (i == 0))
    def _init():
        s_sum[...] = jnp.zeros_like(s_sum)
        s_sq[...] = jnp.zeros_like(s_sq)

    @pl.when(p == 0)
    def _pass0():
        # TODO(synk): PointNetSetAbstraction(sa1)/PointNetFeaturePropagation(fp1) are
        # not provided in the source module; this pointwise MLP 4->256 stands in for
        # them.  K=4 contraction unrolled as f32 VPU broadcast-FMAs (v5e has no bf16
        # VALU; an MXU pass with K=4 would be >96% idle).
        h = aux_ref[:, 4:5] + aux_ref[:, 0:1] * xT_ref[0:1, :]
        for k in range(1, 4):
            h = h + aux_ref[:, k:k + 1] * xT_ref[k:k + 1, :]
        h = jnp.maximum(h, 0.0)                                     # (256, tile) f32

        # Conv1d(256, E, 1): bf16 MXU operands, f32 accumulation.
        z = jnp.dot(w1_ref[...], h.astype(jnp.bfloat16),
                    preferred_element_type=jnp.float32) + aux_ref[:E, 5:6]

        # Stash z (only E x tile f32) and accumulate one-pass BN batch statistics.
        z_buf[:, pl.ds(start, tile)] = z
        s_sum[...] += jnp.sum(z, axis=1, keepdims=True)
        s_sq[...] += jnp.sum(z * z, axis=1, keepdims=True)

    @pl.when(p == 1)
    def _pass1():
        # BatchNorm1d of a freshly constructed module runs in training mode:
        # per-channel batch statistics over ALL B*N points (biased var, eps=1e-5).
        # One-pass E[x^2]-E[x]^2 in f32; clamp guards tiny negative variances.
        inv_n = 1.0 / n_total
        mean = s_sum[...] * inv_n
        var = jnp.maximum(s_sq[...] * inv_n - mean * mean, 0.0)
        scale = aux_ref[:E, 6:7] * lax.rsqrt(var + 1e-5)
        shift = aux_ref[:E, 7:8] - mean * scale

        z = z_buf[:, pl.ds(start, tile)]
        y = jnp.maximum(z * scale + shift, 0.0)                     # (E, tile) f32

        if emit_full:
            # Conv1d(E, E, 1): bf16 MXU, lane-dense (E, tile) store.
            out = jnp.dot(w2_ref[...], y.astype(jnp.bfloat16),
                          preferred_element_type=jnp.float32) + aux_ref[:E, 8:9]
            emb_ref[...] = out
            mean_ref[...] = jnp.mean(out, axis=0, keepdims=True)
        else:
            # Folded channel-mean: mean_E(W2 @ y + b2) = row-mean(W2)·y + mean(b2);
            # the full (E, B*N) embedding is never materialized or stored.
            mean_ref[...] = (jnp.sum(aux_ref[:E, 9:10] * y, axis=0, keepdims=True)
                             + aux_ref[0:1, 10:11])


def _clamp_scale_kernel(v_ref, m_ref, o_ref):
    """normalize_event_volume hot path, tiled over the H*W lane axis:
    row r of the tile becomes clamp(v, -m[r], m[r]) * (1/m[r])."""
    m = m_ref[...]                                 # (R, 1) per-row max_val (resident)
    inv = pl.reciprocal(m, approx=False)           # EUP slot is idle in this mem-bound kernel
    v = v_ref[...]
    o_ref[...] = jnp.minimum(jnp.maximum(v, -m), m) * inv


# ----------------------------- encoder wrappers -----------------------------

def _pack_aux(params):
    aux = jnp.zeros((FEAT_C, AUX_COLS), jnp.float32)
    aux = aux.at[:, 0:4].set(params["w_fp_t"])
    aux = aux.at[:, 4].set(params["b_fp"])
    aux = aux.at[:E, 5].set(params["b_out"])
    aux = aux.at[:E, 6].set(params["bn_gamma"])
    aux = aux.at[:E, 7].set(params["bn_beta"])
    aux = aux.at[:E, 8].set(params["b_out2"])
    aux = aux.at[:E, 9].set(jnp.mean(params["w_out2"], axis=0))   # row-mean over out-channels
    aux = aux.at[0, 10].set(jnp.mean(params["b_out2"]))
    return aux


def _pick_point_tile(total, target):
    assert total % 128 == 0, "B*N must be a multiple of 128"
    t = max(128, (min(target, total) // 128) * 128)
    while total % t:
        t -= 128
    return t


def _enc_vmem_limit(bn_pts, tile, emit_full):
    b = E * bn_pts * 4                    # persistent z_buf scratch
    b += 2 * 32 * 128 * 4                 # s_sum / s_sq (padded)
    b += 2 * 8 * tile * 4                 # xT tile (sublane-padded), double-buffered
    b += 2 * FEAT_C * 128 * 4             # aux (lane-padded)
    b += 2 * E * FEAT_C * 2               # w1 bf16
    b += 2 * E * 128 * 2                  # w2 bf16 (lane-padded)
    b += 2 * 8 * tile * 4                 # mean output tile (sublane-padded)
    if emit_full:
        b += 2 * E * tile * 4             # embedding output tile
    return max(int(1.5 * b) + (2 << 20), 8 << 20)


def _encoder_pallas(params, flow, *, point_tile, emit_full):
    B, N, Cin = flow.shape
    BN = B * N
    tile = _pick_point_tile(BN, point_tile)
    n_tiles = BN // tile

    xT = flow.reshape(BN, Cin).T.astype(jnp.float32)     # (4, B*N): XLA layout plumbing
    aux = _pack_aux(params)
    w1 = params["w_out"].astype(jnp.bfloat16)            # (E, 256)
    w2 = params["w_out2"].astype(jnp.bfloat16)           # (E, E)

    out_shapes, out_specs = [], []
    if emit_full:
        out_shapes.append(jax.ShapeDtypeStruct((E, BN), jnp.float32))
        # i*p: pass 0 never touches blocks 1..T-1; pass 1 writes each block once.
        out_specs.append(pl.BlockSpec((E, tile), lambda p, i: (0, i * p)))
    out_shapes.append(jax.ShapeDtypeStruct((1, BN), jnp.float32))
    out_specs.append(pl.BlockSpec((1, tile), lambda p, i: (0, i * p)))

    return pl.pallas_call(
        functools.partial(_encoder_kernel, emit_full=emit_full),
        out_shape=tuple(out_shapes),
        grid=(2, n_tiles),
        in_specs=[
            # xT is only needed in pass 0; pass 1 pins block 0 (no wasted DMA).
            pl.BlockSpec((Cin, tile), lambda p, i: (0, i * (1 - p))),
            pl.BlockSpec((FEAT_C, AUX_COLS), lambda p, i: (0, 0)),   # resident
            pl.BlockSpec((E, FEAT_C), lambda p, i: (0, 0)),          # resident
            pl.BlockSpec((E, E), lambda p, i: (0, 0)),               # resident
        ],
        out_specs=tuple(out_specs),
        scratch_shapes=[pltpu.VMEM((E, BN), jnp.float32),   # z stash (persists over grid)
                        pltpu.VMEM((E, 1), jnp.float32),    # per-channel sum
                        pltpu.VMEM((E, 1), jnp.float32)],   # per-channel sum of squares
        compiler_params=pltpu.CompilerParams(
            # Both axes "arbitrary": BN batch statistics are GLOBAL over all B*N points,
            # so the point-tile axis cannot be sharded across TensorCores without a
            # cross-core stats reduction (CMEM); the pass axis is inherently ordered.
            dimension_semantics=("arbitrary", "arbitrary"),
            vmem_limit_bytes=_enc_vmem_limit(BN, tile, emit_full)),
    )(xT, aux, w1, w2)


def encoder_forward(params, flow, mask, t_list, *, point_tile=2048):
    """PointNetEncoder.forward (feat_compute=False path). Returns (B, N, E), i.e. the
    PyTorch (B, E, N) output already transposed per batch."""
    del mask, t_list  # only used on the feat_compute=True branch
    B, N, _ = flow.shape
    emb_t, _ = _encoder_pallas(params, flow, point_tile=point_tile, emit_full=True)
    return emb_t.T.reshape(B, N, E)


def encoder_mean_forward(params, flow, *, point_tile=2048):
    """Channel-mean of the encoder output per point, (B, N). The (E, B*N) embedding is
    never stored to HBM on this path (mean folded inside the kernel)."""
    B, N, _ = flow.shape
    (mean_t,) = _encoder_pallas(params, flow, point_tile=point_tile, emit_full=False)
    return mean_t.reshape(B, N)


# ----------------------------- normalize_event_volume ----------------------

def _compute_max_val(vol_flat):
    """normalize_event_volume's quantile logic for one volume.  Replaces the full sort
    with two tiny lax.top_k calls (static k bound ~1e-5*numel+2): exact order
    statistics of the nonzero values, so duplicates behave exactly like kthvalue."""
    total = vol_flat.shape[0]
    k_small = int(1e-5 * total) + 2                 # static bound on both selection ranks
    nz = vol_flat != 0
    n = jnp.sum(nz).astype(jnp.int32)

    top_hi = lax.top_k(jnp.where(nz, vol_flat, -jnp.inf), k_small)[0]   # largest nonzeros
    top_lo = lax.top_k(jnp.where(nz, -vol_flat, -jnp.inf), k_small)[0]  # negated smallest

    k_lo = jnp.maximum(jnp.floor(1e-5 * n).astype(jnp.int32), 1)        # rank (ascending)
    k_hi = jnp.maximum(jnp.floor(0.99999 * n).astype(jnp.int32), 1)
    r_hi = n - k_hi + 1                                                  # rank from the top
    lower = -top_lo[jnp.clip(k_lo - 1, 0, k_small - 1)]
    upper = top_hi[jnp.clip(r_hi - 1, 0, k_small - 1)]
    max_val = jnp.maximum(jnp.abs(lower), upper)     # reference: max(abs(lower), upper)
    # n == 0 -> PyTorch early-returns the (all-zero) volume; m=1 makes the clamp/scale
    # a no-op, matching that branch.
    return jnp.where(n > 0, max_val, jnp.float32(1.0)).astype(jnp.float32)


def normalize_event_volumes(imgs, m_rows, *, lane_tile=4096):
    """clamp(-m, m) * (1/m) for all B*13 channel-images, tiled over the H*W lane axis.
    imgs: (B, 13, H, W); m_rows: (B, 13) per-channel max_val (per volume type)."""
    B, C, H, W = imgs.shape
    R, HW = B * C, H * W
    v2d = imgs.reshape(R, HW).astype(jnp.float32)
    m_col = m_rows.reshape(R, 1).astype(jnp.float32)

    if HW <= lane_tile:
        tile = HW                                    # single full-row block (== array dim)
    else:
        tile = max(128, (lane_tile // 128) * 128)    # lane-dense multiple of 128
    grid = (pl.cdiv(HW, tile),)

    r_pad = ((R + 7) // 8) * 8
    vbytes = 2 * (2 * r_pad * tile * 4) + 2 * r_pad * 128 * 4
    out2d = pl.pallas_call(
        _clamp_scale_kernel,
        out_shape=jax.ShapeDtypeStruct((R, HW), jnp.float32),
        grid=grid,
        in_specs=[pl.BlockSpec((R, tile), lambda i: (0, i)),
                  pl.BlockSpec((R, 1), lambda i: (0, 0))],      # resident per-row max_val
        out_specs=pl.BlockSpec((R, tile), lambda i: (0, i)),
        compiler_params=pltpu.CompilerParams(
            dimension_semantics=("parallel",),                  # shards across TCs on v7x
            vmem_limit_bytes=max(int(1.5 * vbytes) + (2 << 20), 8 << 20)),
    )(v2d, m_col)
    return out2d.reshape(B, C, H, W)


# ----------------------------- autoencoder ---------------------------------

def _scatter_event_image(events, vals, C, H, W, mode):
    # TODO(synk): gen_discretized_event_volume / per_event_timing_images /
    # per_stacking_events / per_event_counting_images are not defined in the provided
    # source; deterministic nearest-neighbour scatter stand-in with matching output
    # channel counts (scatter-add has no clean Pallas TPU path).
    x = jnp.clip(events[:, 0].astype(jnp.int32), 0, W - 1)
    y = jnp.clip(events[:, 1].astype(jnp.int32), 0, H - 1)
    t = events[:, 2]
    p = events[:, 3]
    if mode == "time":
        c = jnp.clip((t * C).astype(jnp.int32), 0, C - 1)
    else:  # polarity binning
        c = jnp.clip(p.astype(jnp.int32), 0, C - 1)
    img = jnp.zeros((C, H, W), jnp.float32)
    return img.at[c, y, x].add(vals)


def pointnet_autoencoder_forward(params, x, flow, flow_ori, mask, t_list, *,
                                 point_tile=2048, lane_tile=4096):
    del mask, t_list
    # Per-point channel-mean of the encoder output, produced directly by the encoder
    # kernel (the full (B, E, N) embedding never round-trips HBM on this path).
    vals = encoder_mean_forward(params, flow, point_tile=point_tile)      # (B, N)
    H, W = x.shape[2], x.shape[3]

    # Batched (vmapped) scatter stand-ins — no per-batch Python loop.
    vol = jax.vmap(lambda e, v: _scatter_event_image(e, v, 6, H, W, "time"))(flow_ori, vals)
    tim = jax.vmap(lambda e, v: _scatter_event_image(e, v, 2, H, W, "pol"))(flow_ori, vals)
    stk = jax.vmap(lambda e, v: _scatter_event_image(e, v, 3, H, W, "time"))(flow_ori, vals)
    cnt = jax.vmap(lambda e, v: _scatter_event_image(e, v, 2, H, W, "pol"))(flow_ori, vals)

    m_of = jax.vmap(lambda v: _compute_max_val(v.reshape(-1)))
    m_stk, m_vol, m_cnt, m_tim = m_of(stk), m_of(vol), m_of(cnt), m_of(tim)   # (B,) each

    # PyTorch concat order: [stacking(3), volume(6), counting(2), time(2)].
    imgs = jnp.concatenate([stk, vol, cnt, tim], axis=1)     # (B, 13, H, W)
    m_rows = jnp.concatenate([
        jnp.repeat(m_stk[:, None], 3, axis=1),
        jnp.repeat(m_vol[:, None], 6, axis=1),
        jnp.repeat(m_cnt[:, None], 2, axis=1),
        jnp.repeat(m_tim[:, None], 2, axis=1),
    ], axis=1)                                               # (B, 13)
    return normalize_event_volumes(imgs, m_rows, lane_tile=lane_tile)   # (B, 13, H, W)


# ----------------------------- main ----------------------------------------

if __name__ == "__main__":
    key = jax.random.PRNGKey(0)
    ks = jax.random.split(key, 12)
    B, H, W = 2, 16, 16

    params = {
        # stand-in fp1 pointwise MLP weight, stored (C_out=256, C_in=4)
        "w_fp_t": 0.1 * jax.random.normal(ks[0], (FEAT_C, 4), jnp.float32),
        "b_fp": 0.1 * jax.random.normal(ks[1], (FEAT_C,), jnp.float32),
        # Conv1d(256, E, 1) / Conv1d(E, E, 1) weights in PyTorch (out, in) layout
        "w_out": 0.1 * jax.random.normal(ks[2], (E, FEAT_C), jnp.float32),
        "b_out": 0.1 * jax.random.normal(ks[3], (E,), jnp.float32),
        "bn_gamma": jnp.ones((E,), jnp.float32),   # BatchNorm1d default affine init
        "bn_beta": jnp.zeros((E,), jnp.float32),
        "w_out2": 0.1 * jax.random.normal(ks[4], (E, E), jnp.float32),
        "b_out2": 0.1 * jax.random.normal(ks[5], (E,), jnp.float32),
    }

    x = jax.random.normal(ks[6], (B, 4, H, W), jnp.float32)
    flow = jax.random.normal(ks[7], (B, N_POINTS, 4), jnp.float32)
    ev_x = jax.random.randint(ks[8], (B, N_POINTS, 1), 0, W).astype(jnp.float32)
    ev_y = jax.random.randint(ks[9], (B, N_POINTS, 1), 0, H).astype(jnp.float32)
    ev_t = jax.random.uniform(ks[10], (B, N_POINTS, 1), dtype=jnp.float32)
    ev_p = jax.random.randint(ks[11], (B, N_POINTS, 1), 0, 2).astype(jnp.float32)
    flow_ori = jnp.concatenate([ev_x, ev_y, ev_t, ev_p], axis=-1)
    mask = jnp.ones((B, N_POINTS, 4), jnp.float32)
    t_list = jnp.zeros((B,), jnp.float32)

    # Small tiles force multi-tile grids (2 point tiles, 2 lane tiles) on toy shapes so
    # the tiled/two-pass code paths are exercised; defaults are production-sized.
    enc_full = jax.jit(functools.partial(encoder_forward, point_tile=128))
    emb = jax.block_until_ready(enc_full(params, flow, mask, t_list))
    assert emb.shape == (B, N_POINTS, E), emb.shape

    fwd = jax.jit(functools.partial(pointnet_autoencoder_forward,
                                    point_tile=128, lane_tile=128))
    out = jax.block_until_ready(fwd(params, x, flow, flow_ori, mask, t_list))
    assert out.shape == (B, 13, H, W), out.shape
    assert bool(jnp.all(jnp.isfinite(out))) and bool(jnp.all(jnp.isfinite(emb)))
    print("KERNEL_OK")
</pallas_src>

<mosaic_0001>
module attributes {stable_mosaic.version = 11 : i64} {
  func.func @_encoder_kernel(%arg0: i32, %arg1: i32, %arg2: memref<4x128xf32, #tpu.memory_space<vmem>>, %arg3: memref<256x16xf32, #tpu.memory_space<vmem>>, %arg4: memref<32x256xbf16, #tpu.memory_space<vmem>>, %arg5: memref<32x32xbf16, #tpu.memory_space<vmem>>, %arg6: memref<32x128xf32, #tpu.memory_space<vmem>>, %arg7: memref<1x128xf32, #tpu.memory_space<vmem>>, %arg8: memref<32x256xf32, #tpu.memory_space<vmem>>, %arg9: memref<32x1xf32, #tpu.memory_space<vmem>>, %arg10: memref<32x1xf32, #tpu.memory_space<vmem>>) attributes {dimension_semantics = [#tpu.dimension_semantics<arbitrary>, #tpu.dimension_semantics<arbitrary>], iteration_bounds = array<i64: 2, 2>, scalar_prefetch = 0 : i64, scratch_operands = 3 : i64, tpu.core_type = #tpu.core_type<tc>, window_params = [{transform_indices = @transform_0, window_bounds = array<i64: 4, 128>}, {pipeline_mode = #tpu.pipeline_mode<synchronous>, transform_indices = @transform_1, window_bounds = array<i64: 256, 16>}, {pipeline_mode = #tpu.pipeline_mode<synchronous>, transform_indices = @transform_2, window_bounds = array<i64: 32, 256>}, {pipeline_mode = #tpu.pipeline_mode<synchronous>, transform_indices = @transform_3, window_bounds = array<i64: 32, 32>}, {transform_indices = @transform_4, window_bounds = array<i64: 32, 128>}, {transform_indices = @transform_5, window_bounds = array<i64: 1, 128>}]} {
    %c128_i32 = arith.constant 128 : i32
    %0 = arith.muli %arg1, %c128_i32 : i32
    %1 = tpu.assume_multiple %0, 128 : i32
    %c0_i32 = arith.constant 0 : i32
    %2 = arith.cmpi eq, %arg0, %c0_i32 : i32
    %c0_i32_0 = arith.constant 0 : i32
    %3 = arith.cmpi eq, %arg1, %c0_i32_0 : i32
    %4 = arith.andi %2, %3 : i1
    %5 = arith.extui %4 : i1 to i32
    %c0_i32_1 = arith.constant 0 : i32
    %6 = arith.cmpi ne, %5, %c0_i32_1 : i32
    scf.if %6 {
      %cst = arith.constant 0.000000e+00 : f32
      %13 = vector.broadcast %cst : f32 to vector<32x1xf32>
      %c0 = arith.constant 0 : index
      %c0_5 = arith.constant 0 : index
      %14 = vector.load %arg9[%c0, %c0_5] : memref<32x1xf32, #tpu.memory_space<vmem>>, vector<32x1xf32>
      tpu.vector_store %arg9[%c0, %c0_5], %13 {strides = array<i32>} : memref<32x1xf32, #tpu.memory_space<vmem>>, vector<32x1xf32>,
      %cst_6 = arith.constant 0.000000e+00 : f32
      %15 = vector.broadcast %cst_6 : f32 to vector<32x1xf32>
      %c0_7 = arith.constant 0 : index
      %c0_8 = arith.constant 0 : index
      %16 = vector.load %arg10[%c0_7, %c0_8] : memref<32x1xf32, #tpu.memory_space<vmem>>, vector<32x1xf32>
      tpu.vector_store %arg10[%c0_7, %c0_8], %15 {strides = array<i32>} : memref<32x1xf32, #tpu.memory_space<vmem>>, vector<32x1xf32>,
    } else {
    }
    %c0_i32_2 = arith.constant 0 : i32
    %7 = arith.cmpi eq, %arg0, %c0_i32_2 : i32
    %8 = arith.extui %7 : i1 to i32
    %c0_i32_3 = arith.constant 0 : i32
    %9 = arith.cmpi ne, %8, %c0_i32_3 : i32
    scf.if %9 {
      %c0 = arith.constant 0 : index
      %c4 = arith.constant 4 : index
      %13 = vector.load %arg3[%c0, %c4] : memref<256x16xf32, #tpu.memory_space<vmem>>, vector<256x1xf32>
      %c0_5 = arith.constant 0 : index
      %c0_6 = arith.constant 0 : index
      %14 = vector.load %arg3[%c0_5, %c0_6] : memref<256x16xf32, #tpu.memory_space<vmem>>, vector<256x1xf32>
      %c0_7 = arith.constant 0 : index
      %c0_8 = arith.constant 0 : index
      %15 = vector.load %arg2[%c0_7, %c0_8] : memref<4x128xf32, #tpu.memory_space<vmem>>, vector<1x128xf32>
      %16 = vector.broadcast %14 : vector<256x1xf32> to vector<256x128xf32>
      %17 = vector.broadcast %15 : vector<1x128xf32> to vector<256x128xf32>
      %18 = arith.mulf %16, %17 : vector<256x128xf32>
      %19 = vector.broadcast %13 : vector<256x1xf32> to vector<256x128xf32>
      %20 = arith.addf %19, %18 : vector<256x128xf32>
      %c0_9 = arith.constant 0 : index
      %c1 = arith.constant 1 : index
      %21 = vector.load %arg3[%c0_9, %c1] : memref<256x16xf32, #tpu.memory_space<vmem>>, vector<256x1xf32>
      %c1_10 = arith.constant 1 : index
      %c0_11 = arith.constant 0 : index
      %22 = vector.load %arg2[%c1_10, %c0_11] : memref<4x128xf32, #tpu.memory_space<vmem>>, vector<1x128xf32>
      %23 = vector.broadcast %21 : vector<256x1xf32> to vector<256x128xf32>
      %24 = vector.broadcast %22 : vector<1x128xf32> to vector<256x128xf32>
      %25 = arith.mulf %23, %24 : vector<256x128xf32>
      %26 = arith.addf %20, %25 : vector<256x128xf32>
      %c0_12 = arith.constant 0 : index
      %c2 = arith.constant 2 : index
      %27 = vector.load %arg3[%c0_12, %c2] : memref<256x16xf32, #tpu.memory_space<vmem>>, vector<256x1xf32>
      %c2_13 = arith.constant 2 : index
      %c0_14 = arith.constant 0 : index
      %28 = vector.load %arg2[%c2_13, %c0_14] : memref<4x128xf32, #tpu.memory_space<vmem>>, vector<1x128xf32>
      %29 = vector.broadcast %27 : vector<256x1xf32> to vector<256x128xf32>
      %30 = vector.broadcast %28 : vector<1x128xf32> to vector<256x128xf32>
      %31 = arith.mulf %29, %30 : vector<256x128xf32>
      %32 = arith.addf %26, %31 : vector<256x128xf32>
      %c0_15 = arith.constant 0 : index
      %c3 = arith.constant 3 : index
      %33 = vector.load %arg3[%c0_15, %c3] : memref<256x16xf32, #tpu.memory_space<vmem>>, vector<256x1xf32>
      %c3_16 = arith.constant 3 : index
      %c0_17 = arith.constant 0 : index
      %34 = vector.load %arg2[%c3_16, %c0_17] : memref<4x128xf32, #tpu.memory_space<vmem>>, vector<1x128xf32>
      %35 = vector.broadcast %33 : vector<256x1xf32> to vector<256x128xf32>
      %36 = vector.broadcast %34 : vector<1x128xf32> to vector<256x128xf32>
      %37 = arith.mulf %35, %36 : vector<256x128xf32>
      %38 = arith.addf %32, %37 : vector<256x128xf32>
      %cst = arith.constant 0.000000e+00 : f32
      %39 = vector.broadcast %cst : f32 to vector<256x128xf32>
      %40 = arith.maximumf %38, %39 : vector<256x128xf32>
      %c0_18 = arith.constant 0 : index
      %c0_19 = arith.constant 0 : index
      %41 = vector.load %arg4[%c0_18, %c0_19] : memref<32x256xbf16, #tpu.memory_space<vmem>>, vector<32x256xbf16>
      %42 = arith.truncf %40 : vector<256x128xf32> to vector<256x128xbf16>
      %cst_20 = arith.constant dense<0.000000e+00> : vector<32x128xf32>
      %43 = tpu.matmul %41, %42, %cst_20 {dimension_numbers = #tpu.dot_dimension_numbers<[1], [0], [0], [1], [0, 0, 1, 1], [], []>} : vector<32x256xbf16>, vector<256x128xbf16>, vector<32x128xf32> -> vector<32x128xf32>
      %c0_21 = arith.constant 0 : index
      %c5 = arith.constant 5 : index
      %44 = vector.load %arg3[%c0_21, %c5] : memref<256x16xf32, #tpu.memory_space<vmem>>, vector<32x1xf32>
      %45 = vector.broadcast %44 : vector<32x1xf32> to vector<32x128xf32>
      %46 = arith.addf %43, %45 : vector<32x128xf32>
      %c0_22 = arith.constant 0 : index
      %47 = arith.index_cast %1 : i32 to index
      %48 = vector.load %arg8[%c0_22, %47] : memref<32x256xf32, #tpu.memory_space<vmem>>, vector<32x128xf32>
      tpu.vector_store %arg8[%c0_22, %47], %46 {strides = array<i32>} : memref<32x256xf32, #tpu.memory_space<vmem>>, vector<32x128xf32>,
      %c0_23 = arith.constant 0 : index
      %c0_24 = arith.constant 0 : index
      %49 = vector.load %arg9[%c0_23, %c0_24] : memref<32x1xf32, #tpu.memory_space<vmem>>, vector<32x1xf32>
      %cst_25 = arith.constant dense<0.000000e+00> : vector<32xf32>
      %50 = vector.multi_reduction <add>, %46, %cst_25 [1] : vector<32x128xf32> to vector<32xf32>
      %51 = vector.shape_cast %50 : vector<32xf32> to vector<32x1xf32>
      %52 = arith.addf %49, %51 : vector<32x1xf32>
      %c0_26 = arith.constant 0 : index
      %c0_27 = arith.constant 0 : index
      %53 = vector.load %arg9[%c0_26, %c0_27] : memref<32x1xf32, #tpu.memory_space<vmem>>, vector<32x1xf32>
      tpu.vector_store %arg9[%c0_26, %c0_27], %52 {strides = array<i32>} : memref<32x1xf32, #tpu.memory_space<vmem>>, vector<32x1xf32>,
      %c0_28 = arith.constant 0 : index
      %c0_29 = arith.constant 0 : index
      %54 = vector.load %arg10[%c0_28, %c0_29] : memref<32x1xf32, #tpu.memory_space<vmem>>, vector<32x1xf32>
      %55 = arith.mulf %46, %46 : vector<32x128xf32>
      %cst_30 = arith.constant dense<0.000000e+00> : vector<32xf32>
      %56 = vector.multi_reduction <add>, %55, %cst_30 [1] : vector<32x128xf32> to vector<32xf32>
      %57 = vector.shape_cast %56 : vector<32xf32> to vector<32x1xf32>
      %58 = arith.addf %54, %57 : vector<32x1xf32>
      %c0_31 = arith.constant 0 : index
      %c0_32 = arith.constant 0 : index
      %59 = vector.load %arg10[%c0_31, %c0_32] : memref<32x1xf32, #tpu.memory_space<vmem>>, vector<32x1xf32>
      tpu.vector_store %arg10[%c0_31, %c0_32], %58 {strides = array<i32>} : memref<32x1xf32, #tpu.memory_space<vmem>>, vector<32x1xf32>,
    } else {
    }
    %c1_i32 = arith.constant 1 : i32
    %10 = arith.cmpi eq, %arg0, %c1_i32 : i32
    %11 = arith.extui %10 : i1 to i32
    %c0_i32_4 = arith.constant 0 : i32
    %12 = arith.cmpi ne, %11, %c0_i32_4 : i32
    scf.if %12 {
      %c0 = arith.constant 0 : index
      %c0_5 = arith.constant 0 : index
      %13 = vector.load %arg9[%c0, %c0_5] : memref<32x1xf32, #tpu.memory_space<vmem>>, vector<32x1xf32>
      %cst = arith.constant 3.906250e-03 : f32
      %14 = vector.broadcast %cst : f32 to vector<32x1xf32>
      %15 = arith.mulf %13, %14 : vector<32x1xf32>
      %c0_6 = arith.constant 0 : index
      %c0_7 = arith.constant 0 : index
      %16 = vector.load %arg10[%c0_6, %c0_7] : memref<32x1xf32, #tpu.memory_space<vmem>>, vector<32x1xf32>
      %cst_8 = arith.constant 3.906250e-03 : f32
      %17 = vector.broadcast %cst_8 : f32 to vector<32x1xf32>
      %18 = arith.mulf %16, %17 : vector<32x1xf32>
      %19 = arith.mulf %15, %15 : vector<32x1xf32>
      %20 = arith.subf %18, %19 : vector<32x1xf32>
      %cst_9 = arith.constant 0.000000e+00 : f32
      %21 = vector.broadcast %cst_9 : f32 to vector<32x1xf32>
      %22 = arith.maximumf %20, %21 : vector<32x1xf32>
      %c0_10 = arith.constant 0 : index
      %c6 = arith.constant 6 : index
      %23 = vector.load %arg3[%c0_10, %c6] : memref<256x16xf32, #tpu.memory_space<vmem>>, vector<32x1xf32>
      %cst_11 = arith.constant 9.99999974E-6 : f32
      %24 = vector.broadcast %cst_11 : f32 to vector<32x1xf32>
      %25 = arith.addf %22, %24 : vector<32x1xf32>
      %26 = math.rsqrt %25 : vector<32x1xf32>
      %27 = arith.mulf %23, %26 : vector<32x1xf32>
      %c0_12 = arith.constant 0 : index
      %c7 = arith.constant 7 : index
      %28 = vector.load %arg3[%c0_12, %c7] : memref<256x16xf32, #tpu.memory_space<vmem>>, vector<32x1xf32>
      %29 = arith.mulf %15, %27 : vector<32x1xf32>
      %30 = arith.subf %28, %29 : vector<32x1xf32>
      %c0_13 = arith.constant 0 : index
      %31 = arith.index_cast %1 : i32 to index
      %32 = vector.load %arg8[%c0_13, %31] : memref<32x256xf32, #tpu.memory_space<vmem>>, vector<32x128xf32>
      %33 = vector.broadcast %27 : vector<32x1xf32> to vector<32x128xf32>
      %34 = arith.mulf %32, %33 : vector<32x128xf32>
      %35 = vector.broadcast %30 : vector<32x1xf32> to vector<32x128xf32>
      %36 = arith.addf %34, %35 : vector<32x128xf32>
      %cst_14 = arith.constant 0.000000e+00 : f32
      %37 = vector.broadcast %cst_14 : f32 to vector<32x128xf32>
      %38 = arith.maximumf %36, %37 : vector<32x128xf32>
      %c0_15 = arith.constant 0 : index
      %c0_16 = arith.constant 0 : index
      %39 = vector.load %arg5[%c0_15, %c0_16] : memref<32x32xbf16, #tpu.memory_space<vmem>>, vector<32x32xbf16>
      %40 = arith.truncf %38 : vector<32x128xf32> to vector<32x128xbf16>
      %cst_17 = arith.constant dense<0.000000e+00> : vector<32x128xf32>
      %41 = tpu.matmul %39, %40, %cst_17 {dimension_numbers = #tpu.dot_dimension_numbers<[1], [0], [0], [1], [0, 0, 1, 1], [], []>} : vector<32x32xbf16>, vector<32x128xbf16>, vector<32x128xf32> -> vector<32x128xf32>
      %c0_18 = arith.constant 0 : index
      %c8 = arith.constant 8 : index
      %42 = vector.load %arg3[%c0_18, %c8] : memref<256x16xf32, #tpu.memory_space<vmem>>, vector<32x1xf32>
      %43 = vector.broadcast %42 : vector<32x1xf32> to vector<32x128xf32>
      %44 = arith.addf %41, %43 : vector<32x128xf32>
      %c0_19 = arith.constant 0 : index
      %c0_20 = arith.constant 0 : index
      %45 = vector.load %arg6[%c0_19, %c0_20] : memref<32x128xf32, #tpu.memory_space<vmem>>, vector<32x128xf32>
      tpu.vector_store %arg6[%c0_19, %c0_20], %44 {strides = array<i32>} : memref<32x128xf32, #tpu.memory_space<vmem>>, vector<32x128xf32>,
      %cst_21 = arith.constant dense<0.000000e+00> : vector<128xf32>
      %46 = vector.multi_reduction <add>, %44, %cst_21 [0] : vector<32x128xf32> to vector<128xf32>
      %47 = vector.shape_cast %46 : vector<128xf32> to vector<1x128xf32>
      %cst_22 = arith.constant 3.200000e+01 : f32
      %48 = vector.broadcast %cst_22 : f32 to vector<1x128xf32>
      %49 = arith.divf %47, %48 : vector<1x128xf32>
      %c0_23 = arith.constant 0 : index
      %c0_24 = arith.constant 0 : index
      %50 = vector.load %arg7[%c0_23, %c0_24] : memref<1x128xf32, #tpu.memory_space<vmem>>, vector<1x128xf32>
      tpu.vector_store %arg7[%c0_23, %c0_24], %49 {strides = array<i32>} : memref<1x128xf32, #tpu.memory_space<vmem>>, vector<1x128xf32>,
    } else {
    }
    return
  }
  func.func @transform_0(%arg0: i32, %arg1: i32) -> (i32, i32) {
    %c1_i32 = arith.constant 1 : i32
    %0 = arith.subi %c1_i32, %arg0 : i32
    %1 = arith.muli %arg1, %0 : i32
    %c0_i32 = arith.constant 0 : i32
    %c0_i32_0 = arith.constant 0 : i32
    return %c0_i32, %1 : i32, i32
  }
  func.func @transform_1(%arg0: i32, %arg1: i32) -> (i32, i32) {
    %c0_i32 = arith.constant 0 : i32
    %c0_i32_0 = arith.constant 0 : i32
    %c0_i32_1 = arith.constant 0 : i32
    return %c0_i32, %c0_i32_0 : i32, i32
  }
  func.func @transform_2(%arg0: i32, %arg1: i32) -> (i32, i32) {
    %c0_i32 = arith.constant 0 : i32
    %c0_i32_0 = arith.constant 0 : i32
    %c0_i32_1 = arith.constant 0 : i32
    return %c0_i32, %c0_i32_0 : i32, i32
  }
  func.func @transform_3(%arg0: i32, %arg1: i32) -> (i32, i32) {
    %c0_i32 = arith.constant 0 : i32
    %c0_i32_0 = arith.constant 0 : i32
    %c0_i32_1 = arith.constant 0 : i32
    return %c0_i32, %c0_i32_0 : i32, i32
  }
  func.func @transform_4(%arg0: i32, %arg1: i32) -> (i32, i32) {
    %0 = arith.muli %arg1, %arg0 : i32
    %c0_i32 = arith.constant 0 : i32
    %c0_i32_0 = arith.constant 0 : i32
    return %c0_i32, %0 : i32, i32
  }
  func.func @transform_5(%arg0: i32, %arg1: i32) -> (i32, i32) {
    %0 = arith.muli %arg1, %arg0 : i32
    %c0_i32 = arith.constant 0 : i32
    %c0_i32_0 = arith.constant 0 : i32
    return %c0_i32, %0 : i32, i32
  }
}

</mosaic_0001>

<bundles_post_ra>
// kernel: encoder_forward.1
= control target key start
LH: loop header
LB: loop body
LE: loop exit
PB: predicated region body
PF: predicated region fallthrough
CT: control target
= control target key end

     0   :  { %11 = vsyncpa [#allocation7], 0  ;;  %s3290_s0 = inlined_call_operand.vmem [shape: f32[4,256], index: 0, kind: input, shape index: {}]   ;;  %s3291_s1 = inlined_call_operand.vmem [shape: f32[256,16], index: 1, kind: input, shape index: {}]   ;;  %s3292_s2 = inlined_call_operand.vmem [shape: bf16[32,256], index: 2, kind: input, shape index: {}]   ;;  %s3293_s3 = inlined_call_operand.vmem [shape: bf16[32,32], index: 3, kind: input, shape index: {}]   ;;  %s3294_s4 = inlined_call_operand.vmem [shape: f32[32,256], index: 4, kind: output, shape index: {0}]   ;;  %s3295_s5 = inlined_call_operand.hbm [shape: f32[1,256], index: 5, kind: output, shape index: {1}]  }
   0x1   :  { %13 = vsyncpa [#allocation7 + $0x1], 0  ;;  %s2211_s18 = smov 0   ;;  %s2213_s19 = smov 0  }
   0x2   :  { %s2215_s20 = smov 0   ;;  %s2217_s21 = smov 0  }
   0x3   :  { %s2219_s22 = smov 0   ;;  %s2221_s23 = smov 0  }
   0x4   :  { %s2223_s24 = smov 0   ;;  %s2225_s25 = smov 0  }
   0x5 LB: > { %s1880_s26 = sadd.s32 4294967295, %s2165_s25   ;;  %s1881_s27 = sadd.s32 4294967294, %s2165_s25   ;;  %s2165_s25 = sphi %s2225_s25, %s19_s25   ;;  %s2161_s24 = sphi %s2223_s24, %s3422_s24   ;;  %s2157_s23 = sphi %s2221_s23, %s3421_s23   ;;  %s2153_s22 = sphi %s2219_s22, %s3420_s22   ;;  %s2149_s21 = sphi %s2217_s21, %s3419_s21   ;;  %s2145_s20 = sphi %s2215_s20, %s3418_s20   ;;  %s2141_s19 = sphi %s2213_s19, %s3417_s19   ;;  %s2137_s18 = sphi %s2211_s18, %s3416_s18  }
   0x6   : > { %s28_s28 = sadd.s32 1, %s2157_s23  ;;  %s31_s29 = sadd.s32 1, %s2161_s24 }
   0x7   : > { %p29_p0 = scmp.ge.s32.totalorder %s28_s28, 2  ;;  %s128_s30 = smul.u32 %s2157_s23, %s2161_s24 }
   0x8   : > { %p143_p1 = scmp.ne.s32.totalorder %s2145_s20, %s2141_s19  ;;  %p144_p2 = scmp.eq.s32.totalorder %s1880_s26, 3 }
   0x9   : > { %s3424_s28 = smov (%p29_p0, %s28_s28), 0  ;;  %s3426_s29 = smov (!%p29_p0, %s31_s29), %s2161_s24 }
   0xa   : > { %p177_p3 = scmp.ne.s32.totalorder %s2141_s19, %s2137_s18  ;;  %p33_p4 = scmp.ge.s32.totalorder %s3426_s29, 2 }
   0xb   : > { %p178_p5 = scmp.eq.s32.totalorder %s1881_s27, 3  ;;  %p2264_p6 = por %p144_p2, %p143_p1 }
   0xc   : > { %p1884_p7 = scmp.ge.s32.totalorder %s2165_s25, 1  ;;  %s3428_s29 = smov (%p33_p4, %s3426_s29), 0 }
   0xd   : > { %p2271_p8 = por %p178_p5, %p177_p3  ;;  %p216_p9 = scmp.lt.s32.totalorder %s2165_s25, 5 }
   0xe   : > { %s129_s8 = smul.u32 %s3428_s29, %s3424_s28  ;;  %s133_s10 = sadd.s32 1, %s2145_s20 }
   0xf   : > { %p217_p10 = pnand %p1884_p7, %p216_p9 }
  0x10   : > { %s130_s9 = ssub.s32 %s128_s30, %s129_s8  ;;  %s2283_s12 = sand.u32 (!%p217_p10), 1, %s2141_s19  }
  0x11   : > { %p131_p11 = scmp.eq.s32.totalorder %s130_s9, 0  ;;  %220 = sbr.rel (%p217_p10) target bundleno = 1577 (0x629), region = 36 }
  0x12   : > { %s248_s13 = ssub.s32 (!%p217_p10), 1, %s2153_s22  ;;  %s1885_s14 = sshll.u32 (!%p217_p10), %s2283_s12, 5 }
  0x13   : > { %s2280_s11 = scalar_select %p131_p11, %s2145_s20, %s133_s10  }
  0x14   : > { %s249_s15 = smul.u32 (!%p217_p10), %s2149_s21, %s248_s13  ;;  %s1887_s16 = sshll.u32 (!%p217_p10), %s2149_s21, 7 }
  0x15   : > { %p260_p12 = scmp.eq.s32.totalorder (!%p217_p10), %s2153_s22, 0  ;;  %p261_p0 = scmp.eq.s32.totalorder (!%p217_p10), %s2149_s21, 0 }
  0x16   : > { %p250_p13 = scmp.lt.s32.totalorder %s249_s15, 1  ;;  %s2296_s8 = scalar_lea.vmem [#allocation5], %s1885_s14 }
  0x17   : > { %p262_p1 = pnand %p261_p0, %p260_p12  ;;  %s247_s9 = scalar_lea.vmem [#allocation6], %s2283_s12 }
  0x18   : > { %s3430_s15 = smov (!%p250_p13, %s249_s15), 1 }
  0x19   : > { %s1886_s17 = sshll.u32 %s3430_s15, 2  ;;  %265 = sbr.rel (%p262_p1) target bundleno = 39 (0x27), region = 40 }
  0x1a   : > { %s2294_s30 = scalar_lea.vmem %s3290_s0, %s1886_s17 }
  0x1e   : > { %vm266_vm0 = vcmask 7168   ;;  %v2167_v0 = vmov 0.0  }
  0x1f   : > { %267 = vst.msk [vmem:[#allocation3] sm:$0xff] %vm266_vm0, %v2167_v0 }
  0x20   : > { %268 = vst.msk [vmem:[#allocation3 + $0x8] sm:$0xff] %vm266_vm0, %v2167_v0 }
  0x21   : > { %269 = vst.msk [vmem:[#allocation3 + $0x10] sm:$0xff] %vm266_vm0, %v2167_v0 }
  0x22   : > { %270 = vst.msk [vmem:[#allocation3 + $0x18] sm:$0xff] %vm266_vm0, %v2167_v0 }
  0x23   : > { %271 = vst.msk [vmem:[#allocation4] sm:$0xff] %vm266_vm0, %v2167_v0 }
  0x24   : > { %272 = vst.msk [vmem:[#allocation4 + $0x8] sm:$0xff] %vm266_vm0, %v2167_v0 }
  0x25   : > { %273 = vst.msk [vmem:[#allocation4 + $0x10] sm:$0xff] %vm266_vm0, %v2167_v0 }
  0x26   : > { %274 = vst.msk [vmem:[#allocation4 + $0x18] sm:$0xff] %vm266_vm0, %v2167_v0 }
  0x27 PF: > { %p1888_p2 = scmp.ne.s32.totalorder %s2153_s22, 0 }
  0x29   : > { %277 = sbr.rel (%p1888_p2) target bundleno = 882 (0x372), region = 44 }
  0x2e   : > { %v2303_v1 = vld [vmem:[%s3291_s1 + $0x20] sm:$0xff]  ;;  %v2308_v2 = vld [vmem:[%s3291_s1 + $0x10] sm:$0xff]  ;;  %v2168_v4 = vmov 0   ;;  %v2321_v5 = vld [vmem:[%s3291_s1 + $0x28] sm:$0xff]  ;;  %v2169_v34 = vmov 4   ;;  %v2170_v59 = vmov 1  }
  0x2f   : > { %v2313_v3 = vld [vmem:[%s3291_s1] sm:$0xff]  ;;  %2033 = vset.pattern.permute.xlu2 %v2168_v4  ;;  %2032 = vset.pattern.permute.xlu1 %v2168_v4  ;;  %v2326_v6 = vld [vmem:[%s3291_s1 + $0x18] sm:$0xff]  ;;  %v2331_v7 = vld [vmem:[%s3291_s1 + $0x8] sm:$0xff]  ;;  %vm1404_vm1 = vcmask 7168  }
  0x30   : > { %3321 = vst [vmem:[#allocation9_spill] sm:$0xff] %v2313_v3  ;;  %2031 = vset.pattern.permute.xlu0 %v2168_v4  ;;  %333 = vperm.xlu2 %2033, %v2303_v1   ;;  %v2339_v8 = vld [vmem:[%s3291_s1 + $0x40] sm:$0xff]  ;;  %v2344_v9 = vld [vmem:[%s3291_s1 + $0x38] sm:$0xff]  ;;  %v2349_v10 = vld [vmem:[%s3291_s1 + $0x30] sm:$0xff] }
  0x31   : > { %323 = vperm.xlu1 %2032, %v2308_v2   ;;  %313 = vperm.xlu0 %2031, %v2313_v3   ;;  %3322 = vst [vmem:[#allocation10_spill] sm:$0xff] %v2326_v6  ;;  %v2357_v11 = vld [vmem:[%s3291_s1 + $0x58] sm:$0xff]  ;;  %v2362_v12 = vld [vmem:[%s3291_s1 + $0x50] sm:$0xff]  ;;  %v2367_v13 = vld [vmem:[%s3291_s1 + $0x48] sm:$0xff] }
  0x32   : > { %3323 = vst [vmem:[#allocation11_spill] sm:$0xff] %v2331_v7  ;;  %v2375_v14 = vld [vmem:[%s3291_s1 + $0x70] sm:$0xff]  ;;  %v2380_v15 = vld [vmem:[%s3291_s1 + $0x68] sm:$0xff]  ;;  %v2385_v16 = vld [vmem:[%s3291_s1 + $0x60] sm:$0xff] }
  0x33   : > { %v2393_v17 = vld [vmem:[%s3291_s1 + $0x88] sm:$0xff]  ;;  %v2398_v18 = vld [vmem:[%s3291_s1 + $0x80] sm:$0xff]  ;;  %v2403_v19 = vld [vmem:[%s3291_s1 + $0x78] sm:$0xff] }
  0x34   : > { %3324 = vst [vmem:[#allocation12_spill] sm:$0xff] %v2393_v17  ;;  %v2411_v20 = vld [vmem:[%s3291_s1 + $0xa0] sm:$0xff]  ;;  %v2416_v21 = vld [vmem:[%s3291_s1 + $0x98] sm:$0xff]  ;;  %v2421_v22 = vld [vmem:[%s3291_s1 + $0x90] sm:$0xff] }
  0x35   : > { %3325 = vst [vmem:[#allocation13_spill] sm:$0xff] %v2398_v18  ;;  %v2429_v23 = vld [vmem:[%s3291_s1 + $0xb8] sm:$0xff]  ;;  %v2434_v24 = vld [vmem:[%s3291_s1 + $0xb0] sm:$0xff]  ;;  %v2439_v25 = vld [vmem:[%s3291_s1 + $0xa8] sm:$0xff] }
  0x36   : > { %3326 = vst [vmem:[#allocation14_spill] sm:$0xff] %v2411_v20  ;;  %v2447_v26 = vld [vmem:[%s3291_s1 + $0xd0] sm:$0xff]  ;;  %v2452_v27 = vld [vmem:[%s3291_s1 + $0xc8] sm:$0xff]  ;;  %v2457_v28 = vld [vmem:[%s3291_s1 + $0xc0] sm:$0xff] }
  0x37   : > { %3327 = vst [vmem:[#allocation15_spill] sm:$0xff] %v2416_v21  ;;  %v2465_v29 = vld [vmem:[%s3291_s1 + $0xe8] sm:$0xff]  ;;  %v2470_v30 = vld [vmem:[%s3291_s1 + $0xe0] sm:$0xff]  ;;  %v2475_v31 = vld [vmem:[%s3291_s1 + $0xd8] sm:$0xff] }
  0x38   : > { %338 = vperm.xlu2 %2033, %v2321_v5   ;;  %3328 = vst [vmem:[#allocation16_spill] sm:$0xff] %v2421_v22  ;;  %v2483_v32 = vld [vmem:[%s3291_s1 + $0xf8] sm:$0xff]  ;;  %v2488_v33 = vld [vmem:[%s3291_s1 + $0xf0] sm:$0xff] }
  0x39   : > { %328 = vperm.xlu1 %2032, %v2326_v6   ;;  %318 = vperm.xlu0 %2031, %v2331_v7   ;;  %3329 = vst [vmem:[#allocation17_spill] sm:$0xff] %v2429_v23 }
  0x3a   : > { %3330 = vst [vmem:[#allocation18_spill] sm:$0xff] %v2434_v24 }
  0x3b   : > { %3331 = vst [vmem:[#allocation19_spill] sm:$0xff] %v2439_v25 }
  0x3c   : > { %3332 = vst [vmem:[#allocation20_spill] sm:$0xff] %v2447_v26 }
  0x3d   : > { %3333 = vst [vmem:[#allocation21_spill] sm:$0xff] %v2465_v29 }
  0x3e   : > { %3334 = vst [vmem:[#allocation22_spill] sm:$0xff] %v2483_v32 }
  0x40   : > { %353 = vperm.xlu2 %2033, %v2339_v8  }
  0x41   : > { %348 = vperm.xlu1 %2032, %v2344_v9   ;;  %343 = vperm.xlu0 %2031, %v2349_v10  }
  0x48   : > { %368 = vperm.xlu2 %2033, %v2357_v11  }
  0x49   : > { %363 = vperm.xlu1 %2032, %v2362_v12   ;;  %358 = vperm.xlu0 %2031, %v2367_v13  }
  0x50   : > { %383 = vperm.xlu2 %2033, %v2375_v14  }
  0x51   : > { %378 = vperm.xlu1 %2032, %v2380_v15   ;;  %373 = vperm.xlu0 %2031, %v2385_v16  }
  0x58   : > { %398 = vperm.xlu2 %2033, %v2393_v17  }
  0x59   : > { %393 = vperm.xlu1 %2032, %v2398_v18   ;;  %388 = vperm.xlu0 %2031, %v2403_v19  }
  0x60   : > { %413 = vperm.xlu2 %2033, %v2411_v20  }
  0x61   : > { %408 = vperm.xlu1 %2032, %v2416_v21   ;;  %403 = vperm.xlu0 %2031, %v2421_v22  }
  0x68   : > { %428 = vperm.xlu2 %2033, %v2429_v23  }
  0x69   : > { %423 = vperm.xlu1 %2032, %v2434_v24   ;;  %418 = vperm.xlu0 %2031, %v2439_v25  }
  0x70   : > { %443 = vperm.xlu2 %2033, %v2447_v26  }
  0x71   : > { %438 = vperm.xlu1 %2032, %v2452_v27   ;;  %433 = vperm.xlu0 %2031, %v2457_v28  }
  0x78   : > { %458 = vperm.xlu2 %2033, %v2465_v29  }
  0x79   : > { %453 = vperm.xlu1 %2032, %v2470_v30   ;;  %448 = vperm.xlu0 %2031, %v2475_v31  }
  0x80   : > { %2034 = vset.pattern.permute.xlu2 %v2169_v34 }
  0x81   : > { %468 = vperm.xlu1 %2032, %v2483_v32   ;;  %463 = vperm.xlu0 %2031, %v2488_v33  }
  0x82   : > { %505 = vperm.xlu2 %2034, %v2313_v3  }
  0x89   : > { %2036 = vset.pattern.permute.xlu1 %v2169_v34  ;;  %2035 = vset.pattern.permute.xlu0 %v2169_v34 }
  0x8a   : > { %513 = vperm.xlu1 %2036, %v2308_v2   ;;  %517 = vperm.xlu2 %2034, %v2326_v6   ;;  %v2495_v35 = vpop.permute.xlu2 %333 }
  0x8b   : > { %509 = vperm.xlu0 %2035, %v2331_v7  }
  0x92   : > { %521 = vperm.xlu1 %2036, %v2303_v1   ;;  %525 = vperm.xlu2 %2034, %v2321_v5   ;;  %v2500_v36 = vpop.permute.xlu2 %338 }
  0x93   : > { %529 = vperm.xlu0 %2035, %v2349_v10  }
  0x9a   : > { %533 = vperm.xlu1 %2036, %v2344_v9   ;;  %537 = vperm.xlu2 %2034, %v2339_v8   ;;  %v2505_v37 = vpop.permute.xlu2 %353 }
  0x9b   : > { %541 = vperm.xlu0 %2035, %v2367_v13  }
  0xa2   : > { %545 = vperm.xlu1 %2036, %v2362_v12   ;;  %549 = vperm.xlu2 %2034, %v2357_v11   ;;  %v2510_v38 = vpop.permute.xlu2 %368 }
  0xa3   : > { %553 = vperm.xlu0 %2035, %v2385_v16   ;;  %v2513_v39 = vpop.permute.xlu1 %323  ;;  %v2515_v40 = vpop.permute.xlu0 %313 }
  0xaa   : > { %557 = vperm.xlu1 %2036, %v2380_v15   ;;  %561 = vperm.xlu2 %2034, %v2375_v14   ;;  %v2519_v41 = vpop.permute.xlu2 %383 }
  0xab   : > { %565 = vperm.xlu0 %2035, %v2403_v19   ;;  %v2522_v42 = vpop.permute.xlu1 %328  ;;  %v2524_v43 = vpop.permute.xlu0 %318 }
  0xb2   : > { %569 = vperm.xlu1 %2036, %v2398_v18   ;;  %573 = vperm.xlu2 %2034, %v2393_v17   ;;  %v2528_v44 = vpop.permute.xlu2 %398 }
  0xb3   : > { %3335 = vst [vmem:[#allocation23_spill] sm:$0xff] %v2528_v44  ;;  %577 = vperm.xlu0 %2035, %v2421_v22   ;;  %v2531_v45 = vpop.permute.xlu1 %348  ;;  %v2533_v46 = vpop.permute.xlu0 %343 }
  0xb4   : > { %3336 = vst [vmem:[#allocation24_spill] sm:$0xff] %v2531_v45 }
  0xba   : > { %581 = vperm.xlu1 %2036, %v2416_v21   ;;  %585 = vperm.xlu2 %2034, %v2411_v20   ;;  %v2537_v47 = vpop.permute.xlu2 %413 }
  0xbb   : > { %3337 = vst [vmem:[#allocation25_spill] sm:$0xff] %v2537_v47  ;;  %589 = vperm.xlu0 %2035, %v2439_v25   ;;  %v2540_v48 = vpop.permute.xlu1 %363  ;;  %v2542_v49 = vpop.permute.xlu0 %358 }
  0xbc   : > { %3338 = vst [vmem:[#allocation26_spill] sm:$0xff] %v2540_v48 }
  0xc2   : > { %593 = vperm.xlu1 %2036, %v2434_v24   ;;  %597 = vperm.xlu2 %2034, %v2429_v23   ;;  %v2546_v50 = vpop.permute.xlu2 %428 }
  0xc3   : > { %3339 = vst [vmem:[#allocation27_spill] sm:$0xff] %v2546_v50  ;;  %601 = vperm.xlu0 %2035, %v2457_v28   ;;  %v2549_v51 = vpop.permute.xlu1 %378  ;;  %v2551_v52 = vpop.permute.xlu0 %373 }
  0xc4   : > { %3340 = vst [vmem:[#allocation28_spill] sm:$0xff] %v2549_v51 }
  0xc5   : > { %3341 = vst [vmem:[#allocation29_spill] sm:$0xff] %v2551_v52 }
  0xca   : > { %605 = vperm.xlu1 %2036, %v2452_v27   ;;  %609 = vperm.xlu2 %2034, %v2447_v26   ;;  %v2555_v53 = vpop.permute.xlu2 %443 }
  0xcb   : > { %3342 = vst [vmem:[#allocation30_spill] sm:$0xff] %v2555_v53  ;;  %613 = vperm.xlu0 %2035, %v2475_v31   ;;  %v2558_v54 = vpop.permute.xlu1 %393  ;;  %v389_v55 = vpop.permute.xlu0 %388 }
  0xcc   : > { %3343 = vst [vmem:[#allocation31_spill] sm:$0xff] %v2558_v54 }
  0xd2   : > { %617 = vperm.xlu1 %2036, %v2470_v30   ;;  %621 = vperm.xlu2 %2034, %v2465_v29   ;;  %v2562_v56 = vpop.permute.xlu2 %458 }
  0xd3   : > { %3344 = vst [vmem:[#allocation32_spill] sm:$0xff] %v2562_v56  ;;  %625 = vperm.xlu0 %2035, %v2488_v33   ;;  %v2565_v57 = vpop.permute.xlu1 %408  ;;  %v2567_v58 = vpop.permute.xlu0 %403 }
  0xd4   : > { %3345 = vst [vmem:[#allocation33_spill] sm:$0xff] %v2565_v57 }
  0xda   : > { %629 = vperm.xlu1 %2036, %v2483_v32   ;;  %2037 = vset.pattern.permute.xlu2 %v2170_v59 }
  0xdb   : > { %2038 = vset.pattern.permute.xlu0 %v2170_v59  ;;  %v2570_v60 = vpop.permute.xlu1 %423  ;;  %666 = vperm.xlu2 %2037, %v2313_v3   ;;  %v2573_v61 = vpop.permute.xlu0 %418 }
  0xdc   : > { %3346 = vst [vmem:[#allocation34_spill] sm:$0xff] %v2570_v60  ;;  %670 = vperm.xlu0 %2038, %v2331_v7   ;;  %v2576_v62 = vpop.permute.xlu2 %505 }
  0xe2   : > { %2039 = vset.pattern.permute.xlu1 %v2170_v59 }
  0xe3   : > { %674 = vperm.xlu1 %2039, %v2308_v2   ;;  %v2579_v63 = vpop.permute.xlu1 %438  ;;  %678 = vperm.xlu2 %2037, %v2326_v6   ;;  %v2582_v0 = vpop.permute.xlu0 %433 }
  0xe4   : > { %3347 = vst [vmem:[#allocation35_spill] sm:$0xff] %v2579_v63  ;;  %690 = vperm.xlu0 %2038, %v2349_v10   ;;  %v2585_v4 = vpop.permute.xlu2 %517 }
  0xeb   : > { %682 = vperm.xlu1 %2039, %v2303_v1   ;;  %v2588_v34 = vpop.permute.xlu1 %453  ;;  %686 = vperm.xlu2 %2037, %v2321_v5   ;;  %v2591_v60 = vpop.permute.xlu0 %448 }
  0xec   : > { %3348 = vst [vmem:[#allocation36_spill] sm:$0xff] %v2588_v34  ;;  %702 = vperm.xlu0 %2038, %v2367_v13   ;;  %v2594_v59 = vpop.permute.xlu2 %525 }
  0xf3   : > { %694 = vperm.xlu1 %2039, %v2344_v9   ;;  %v2597_v63 = vpop.permute.xlu1 %468  ;;  %698 = vperm.xlu2 %2037, %v2339_v8   ;;  %v2600_v57 = vpop.permute.xlu0 %463 }
  0xf4   : > { %714 = vperm.xlu0 %2038, %v2385_v16   ;;  %v2603_v56 = vpop.permute.xlu2 %537 }
  0xfb   : > { %706 = vperm.xlu1 %2039, %v2362_v12   ;;  %710 = vperm.xlu2 %2037, %v2357_v11  }
  0xfc   : > { %726 = vperm.xlu0 %2038, %v2403_v19   ;;  %v2608_v34 = vpop.permute.xlu1 %513  ;;  %v2610_v54 = vpop.permute.xlu2 %549 }
  0xfd   : > { %v2612_v53 = vpop.permute.xlu0 %509 }
 0x103   : > { %718 = vperm.xlu1 %2039, %v2380_v15   ;;  %722 = vperm.xlu2 %2037, %v2375_v14  }
 0x104   : > { %738 = vperm.xlu0 %2038, %v2421_v22   ;;  %v2617_v51 = vpop.permute.xlu1 %521  ;;  %v2619_v50 = vpop.permute.xlu2 %561 }
 0x105   : > { %3349 = vst [vmem:[#allocation37_spill] sm:$0xff] %v2619_v50  ;;  %v2621_v48 = vpop.permute.xlu0 %529 }
 0x10b   : > { %730 = vperm.xlu1 %2039, %v2398_v18   ;;  %734 = vperm.xlu2 %2037, %v2393_v17   ;;  %v2642_v17 = vld [vmem:[%s2294_s30] ss:$0 sm:$0xff] }
 0x10c   : > { %750 = vperm.xlu0 %2038, %v2439_v25   ;;  %v2626_v47 = vpop.permute.xlu1 %533  ;;  %v2628_v52 = vpop.permute.xlu2 %573 }
 0x10d   : > { %3350 = vst [vmem:[#allocation38_spill] sm:$0xff] %v2626_v47  ;;  %v2630_v45 = vpop.permute.xlu0 %541 }
 0x10e   : > { %3351 = vst [vmem:[#allocation39_spill] sm:$0xff] %v2628_v52  ;;  %v487_v52 = vmul.f32 %v2642_v17, %v389_v55 }
 0x113   : > { %742 = vperm.xlu1 %2039, %v2416_v21   ;;  %746 = vperm.xlu2 %2037, %v2411_v20  }
 0x114   : > { %762 = vperm.xlu0 %2038, %v2457_v28   ;;  %v2635_v44 = vpop.permute.xlu1 %545  ;;  %v2637_v50 = vpop.permute.xlu2 %585 }
 0x115   : > { %3352 = vst [vmem:[#allocation40_spill] sm:$0xff] %v2635_v44  ;;  %v2639_v18 = vpop.permute.xlu0 %553 }
 0x116   : > { %3353 = vst [vmem:[#allocation41_spill] sm:$0xff] %v2637_v50 }
 0x11b   : > { %754 = vperm.xlu1 %2039, %v2434_v24   ;;  %758 = vperm.xlu2 %2037, %v2429_v23   ;;  %v490_v24 = vmul.f32 %v2642_v17, %v2567_v58 }
 0x11c   : > { %774 = vperm.xlu0 %2038, %v2475_v31   ;;  %v2648_v21 = vpop.permute.xlu1 %557  ;;  %v2650_v20 = vpop.permute.xlu2 %597 }
 0x11d   : > { %3354 = vst [vmem:[#allocation42_spill] sm:$0xff] %v2648_v21  ;;  %v566_v47 = vpop.permute.xlu0 %565 }
 0x11e   : > { %v2652_v44 = vadd.f32 %v566_v47, %v487_v52  ;;  %v493_v47 = vmul.f32 %v2642_v17, %v2573_v61  ;;  %v2171_v52 = vmov 2   ;;  %v496_v61 = vmul.f32 %v2642_v17, %v2582_v0 }
 0x11f   : > { %v499_v0 = vmul.f32 %v2642_v17, %v2591_v60  ;;  %v477_v60 = vmul.f32 %v2642_v17, %v2500_v36 }
 0x123   : > { %766 = vperm.xlu1 %2039, %v2452_v27   ;;  %770 = vperm.xlu2 %2037, %v2447_v26  }
 0x124   : > { %786 = vperm.xlu0 %2038, %v2488_v33   ;;  %v2659_v55 = vpop.permute.xlu1 %569  ;;  %v2661_v23 = vpop.permute.xlu2 %609 }
 0x125   : > { %3355 = vst [vmem:[#allocation43_spill] sm:$0xff] %v2659_v55  ;;  %v578_v21 = vpop.permute.xlu0 %577 }
 0x126   : > { %3356 = vst [vmem:[#allocation44_spill] sm:$0xff] %v2661_v23  ;;  %v2663_v50 = vadd.f32 %v578_v21, %v490_v24  ;;  %v2677_v21 = vld [vmem:[%s2294_s30 + $0x1] ss:$0 sm:$0xff]  ;;  %v472_v24 = vmul.f32 %v2642_v17, %v2515_v40  ;;  %v475_v40 = vmul.f32 %v2642_v17, %v2522_v42 }
 0x12b   : > { %778 = vperm.xlu1 %2039, %v2470_v30   ;;  %782 = vperm.xlu2 %2037, %v2465_v29  }
 0x12c   : > { %2041 = vset.pattern.permute.xlu0 %v2171_v52  ;;  %v2669_v58 = vpop.permute.xlu1 %581  ;;  %v2671_v26 = vpop.permute.xlu2 %621 }
 0x12d   : > { %3357 = vst [vmem:[#allocation45_spill] sm:$0xff] %v2669_v58  ;;  %864 = vperm.xlu0 %2041, %v2331_v7   ;;  %v590_v55 = vpop.permute.xlu0 %589 }
 0x12e   : > { %3358 = vst [vmem:[#allocation46_spill] sm:$0xff] %v2671_v26  ;;  %v2674_v23 = vadd.f32 %v590_v55, %v493_v47  ;;  %v632_v47 = vadd.f32 %v2576_v62, %v472_v24 }
 0x133   : > { %790 = vperm.xlu1 %2039, %v2483_v32   ;;  %2040 = vset.pattern.permute.xlu2 %v2171_v52 }
 0x134   : > { %v2684_v29 = vpop.permute.xlu1 %593  ;;  %860 = vperm.xlu2 %2040, %v2313_v3  }
 0x135   : > { %884 = vperm.xlu0 %2041, %v2349_v10   ;;  %v602_v7 = vpop.permute.xlu0 %601  ;;  %v667_v55 = vpop.permute.xlu2 %666 }
 0x136   : > { %v2689_v26 = vadd.f32 %v602_v7, %v496_v61  ;;  %v794_v32 = vmul.f32 %v2677_v21, %v667_v55  ;;  %v502_v61 = vmul.f32 %v2642_v17, %v2600_v57  ;;  %v503_v57 = vmul.f32 %v2642_v17, %v2597_v63 }
 0x138   : > { %v2692_v58 = vadd.f32 %v794_v32, %v632_v47  ;;  %v635_v32 = vadd.f32 %v2585_v4, %v475_v40  ;;  %v637_v40 = vadd.f32 %v2594_v59, %v477_v60  ;;  %v473_v59 = vmul.f32 %v2642_v17, %v2524_v43 }
 0x139   : > { %v483_v43 = vmul.f32 %v2642_v17, %v2510_v38 }
 0x13b   : > { %2042 = vset.pattern.permute.xlu1 %v2171_v52 }
 0x13c   : > { %868 = vperm.xlu1 %2042, %v2308_v2   ;;  %v2699_v3 = vpop.permute.xlu1 %605  ;;  %872 = vperm.xlu2 %2040, %v2326_v6   ;;  %v3376_v6 = vld [vmem:[#allocation27_spill] sm:$0xff] }
 0x13d   : > { %896 = vperm.xlu0 %2041, %v2367_v13   ;;  %v614_v7 = vpop.permute.xlu0 %613  ;;  %v679_v62 = vpop.permute.xlu2 %678 }
 0x13e   : > { %v2704_v24 = vadd.f32 %v614_v7, %v499_v0  ;;  %v797_v52 = vmul.f32 %v2677_v21, %v679_v62  ;;  %v480_v62 = vmul.f32 %v2642_v17, %v2505_v37  ;;  %v633_v37 = vadd.f32 %v2612_v53, %v473_v59 }
 0x13f   : > { %v643_v59 = vadd.f32 %v2610_v54, %v483_v43  ;;  %v486_v54 = vmul.f32 %v2642_v17, %v2519_v41 }
 0x140   : > { %v2707_v42 = vadd.f32 %v797_v52, %v635_v32 }
 0x144   : > { %876 = vperm.xlu1 %2042, %v2303_v1   ;;  %v2714_v55 = vpop.permute.xlu1 %617  ;;  %880 = vperm.xlu2 %2040, %v2321_v5  }
 0x145   : > { %908 = vperm.xlu0 %2041, %v2385_v16   ;;  %v626_v4 = vpop.permute.xlu0 %625  ;;  %v687_v47 = vpop.permute.xlu2 %686 }
 0x146   : > { %v2719_v0 = vadd.f32 %v626_v4, %v502_v61  ;;  %v799_v7 = vmul.f32 %v2677_v21, %v687_v47  ;;  %v640_v61 = vadd.f32 %v2603_v56, %v480_v62  ;;  %v478_v56 = vmul.f32 %v2642_v17, %v2533_v46 }
 0x148   : > { %v2722_v36 = vadd.f32 %v799_v7, %v637_v40 }
 0x14c   : > { %888 = vperm.xlu1 %2042, %v2344_v9   ;;  %v630_v32 = vpop.permute.xlu1 %629  ;;  %892 = vperm.xlu2 %2040, %v2339_v8  }
 0x14d   : > { %v2732_v52 = vadd.f32 %v630_v32, %v503_v57  ;;  %920 = vperm.xlu0 %2041, %v2403_v19   ;;  %v699_v60 = vpop.permute.xlu2 %698  ;;  %v474_v57 = vmul.f32 %v2642_v17, %v2513_v39 }
 0x14e   : > { %v802_v63 = vmul.f32 %v2677_v21, %v699_v60  ;;  %v671_v4 = vpop.permute.xlu0 %670 }
 0x14f   : > { %v795_v47 = vmul.f32 %v2677_v21, %v671_v4  ;;  %v634_v32 = vadd.f32 %v2608_v34, %v474_v57  ;;  %v476_v34 = vmul.f32 %v2642_v17, %v2495_v35 }
 0x150   : > { %v2739_v40 = vadd.f32 %v802_v63, %v640_v61  ;;  %v638_v61 = vadd.f32 %v2621_v48, %v478_v56  ;;  %v481_v48 = vmul.f32 %v2642_v17, %v2542_v49  ;;  %v3359_v56 = vld [vmem:[#allocation37_spill] sm:$0xff] }
 0x151   : > { %v2741_v7 = vadd.f32 %v795_v47, %v633_v37  ;;  %v636_v57 = vadd.f32 %v2617_v51, %v476_v34  ;;  %v3363_v34 = vld [vmem:[#allocation13_spill] sm:$0xff] }
 0x154   : > { %900 = vperm.xlu1 %2042, %v2362_v12   ;;  %904 = vperm.xlu2 %2040, %v2357_v11  }
 0x155   : > { %932 = vperm.xlu0 %2041, %v2421_v22   ;;  %v675_v53 = vpop.permute.xlu1 %674  ;;  %v711_v62 = vpop.permute.xlu2 %710 }
 0x156   : > { %v796_v38 = vmul.f32 %v2677_v21, %v675_v53  ;;  %v805_v60 = vmul.f32 %v2677_v21, %v711_v62  ;;  %v691_v39 = vpop.permute.xlu0 %690  ;;  %v646_v53 = vadd.f32 %v3359_v56, %v486_v54  ;;  %v3364_v54 = vld [vmem:[#allocation12_spill] sm:$0xff] }
 0x157   : > { %v800_v63 = vmul.f32 %v2677_v21, %v691_v39  ;;  %v3361_v39 = vld [vmem:[#allocation23_spill] sm:$0xff] }
 0x158   : > { %v2758_v4 = vadd.f32 %v796_v38, %v634_v32  ;;  %v2760_v46 = vadd.f32 %v805_v60, %v643_v59  ;;  %v641_v32 = vadd.f32 %v2630_v45, %v481_v48  ;;  %v489_v51 = vmul.f32 %v2642_v17, %v3361_v39 }
 0x159   : > { %v2762_v37 = vadd.f32 %v800_v63, %v638_v61  ;;  %v3362_v61 = vld [vmem:[#allocation24_spill] sm:$0xff] }
 0x15a   : > { %v479_v63 = vmul.f32 %v2642_v17, %v3362_v61 }
 0x15c   : > { %912 = vperm.xlu1 %2042, %v2380_v15   ;;  %916 = vperm.xlu2 %2040, %v2375_v14  }
 0x15d   : > { %944 = vperm.xlu0 %2041, %v2439_v25   ;;  %v683_v47 = vpop.permute.xlu1 %682  ;;  %v723_v43 = vpop.permute.xlu2 %722  ;;  %v495_v25 = vmul.f32 %v2642_v17, %v3376_v6 }
 0x15e   : > { %v798_v35 = vmul.f32 %v2677_v21, %v683_v47  ;;  %v808_v62 = vmul.f32 %v2677_v21, %v723_v43  ;;  %v703_v41 = vpop.permute.xlu0 %702  ;;  %v3365_v47 = vld [vmem:[#allocation29_spill] sm:$0xff] }
 0x15f   : > { %v803_v59 = vmul.f32 %v2677_v21, %v703_v41  ;;  %v484_v45 = vmul.f32 %v2642_v17, %v3365_v47 }
 0x160   : > { %v2779_v38 = vadd.f32 %v798_v35, %v636_v57  ;;  %v2781_v49 = vadd.f32 %v808_v62, %v646_v53  ;;  %v3366_v57 = vld [vmem:[#allocation38_spill] sm:$0xff]  ;;  %v3367_v53 = vld [vmem:[#allocation39_spill] sm:$0xff] }
 0x161   : > { %v2783_v60 = vadd.f32 %v803_v59, %v641_v32  ;;  %v639_v56 = vadd.f32 %v3366_v57, %v479_v63  ;;  %v649_v35 = vadd.f32 %v3367_v53, %v489_v51  ;;  %v644_v59 = vadd.f32 %v2639_v18, %v484_v45  ;;  %v3369_v57 = vld [vmem:[#allocation26_spill] sm:$0xff] }
 0x162   : > { %3360 = vst [vmem:[#allocation37_spill] sm:$0xff] %v2781_v49  ;;  %v482_v51 = vmul.f32 %v2642_v17, %v3369_v57 }
 0x164   : > { %924 = vperm.xlu1 %2042, %v3363_v34   ;;  %928 = vperm.xlu2 %2040, %v3364_v54   ;;  %v3368_v54 = vld [vmem:[#allocation25_spill] sm:$0xff] }
 0x165   : > { %956 = vperm.xlu0 %2041, %v2457_v28   ;;  %v695_v48 = vpop.permute.xlu1 %694  ;;  %v735_v43 = vpop.permute.xlu2 %734  ;;  %v492_v63 = vmul.f32 %v2642_v17, %v3368_v54 }
 0x166   : > { %v801_v62 = vmul.f32 %v2677_v21, %v695_v48  ;;  %v811_v41 = vmul.f32 %v2677_v21, %v735_v43  ;;  %v715_v32 = vpop.permute.xlu0 %714  ;;  %v3370_v48 = vld [vmem:[#allocation15_spill] sm:$0xff]  ;;  %v3371_v43 = vld [vmem:[#allocation14_spill] sm:$0xff] }
 0x167   : > { %v806_v39 = vmul.f32 %v2677_v21, %v715_v32 }
 0x168   : > { %v2800_v61 = vadd.f32 %v801_v62, %v639_v56  ;;  %v2802_v47 = vadd.f32 %v811_v41, %v649_v35  ;;  %v3372_v56 = vld [vmem:[#allocation40_spill] sm:$0xff]  ;;  %v3373_v35 = vld [vmem:[#allocation41_spill] sm:$0xff] }
 0x169   : > { %v2804_v49 = vadd.f32 %v806_v39, %v644_v59  ;;  %v642_v53 = vadd.f32 %v3372_v56, %v482_v51  ;;  %v652_v62 = vadd.f32 %v3373_v35, %v492_v63  ;;  %v3377_v51 = vld [vmem:[#allocation28_spill] sm:$0xff]  ;;  %v3378_v56 = vld [vmem:[#allocation18_spill] sm:$0xff] }
 0x16a   : > { %v485_v63 = vmul.f32 %v2642_v17, %v3377_v51  ;;  %v3380_v35 = vld [vmem:[#allocation42_spill] sm:$0xff] }
 0x16c   : > { %936 = vperm.xlu1 %2042, %v3370_v48   ;;  %940 = vperm.xlu2 %2040, %v3371_v43   ;;  %v3384_v43 = vld [vmem:[#allocation30_spill] sm:$0xff] }
 0x16d   : > { %968 = vperm.xlu0 %2041, %v2475_v31   ;;  %v707_v18 = vpop.permute.xlu1 %706  ;;  %v747_v45 = vpop.permute.xlu2 %746 }
 0x16e   : > { %v804_v41 = vmul.f32 %v2677_v21, %v707_v18  ;;  %v814_v32 = vmul.f32 %v2677_v21, %v747_v45  ;;  %v727_v54 = vpop.permute.xlu0 %726  ;;  %v3379_v18 = vld [vmem:[#allocation17_spill] sm:$0xff] }
 0x16f   : > { %v809_v59 = vmul.f32 %v2677_v21, %v727_v54 }
 0x170   : > { %v2818_v39 = vadd.f32 %v804_v41, %v642_v53  ;;  %v2820_v57 = vadd.f32 %v814_v32, %v652_v62  ;;  %v645_v62 = vadd.f32 %v3380_v35, %v485_v63  ;;  %v655_v41 = vadd.f32 %v2650_v20, %v495_v25  ;;  %v3385_v63 = vld [vmem:[#allocation31_spill] sm:$0xff]  ;;  %v3386_v25 = vld [vmem:[#allocation20_spill] sm:$0xff] }
 0x171   : > { %v2823_v22 = vadd.f32 %v809_v59, %v2652_v44  ;;  %v488_v20 = vmul.f32 %v2642_v17, %v3385_v63 }
 0x172   : > { %3374 = vst [vmem:[#allocation23_spill] sm:$0xff] %v2820_v57  ;;  %v498_v57 = vmul.f32 %v2642_v17, %v3384_v43 }
 0x173   : > { %3375 = vst [vmem:[#allocation24_spill] sm:$0xff] %v2823_v22 }
 0x174   : > { %948 = vperm.xlu1 %2042, %v3378_v56   ;;  %952 = vperm.xlu2 %2040, %v3379_v18  }
 0x175   : > { %980 = vperm.xlu0 %2041, %v2488_v33   ;;  %v719_v45 = vpop.permute.xlu1 %718  ;;  %v759_v53 = vpop.permute.xlu2 %758 }
 0x176   : > { %v807_v44 = vmul.f32 %v2677_v21, %v719_v45  ;;  %v817_v32 = vmul.f32 %v2677_v21, %v759_v53  ;;  %v739_v6 = vpop.permute.xlu0 %738  ;;  %v2172_v45 = vmov 3  }
 0x177   : > { %v812_v54 = vmul.f32 %v2677_v21, %v739_v6 }
 0x178   : > { %v2837_v59 = vadd.f32 %v807_v44, %v645_v62  ;;  %v2839_v51 = vadd.f32 %v817_v32, %v655_v41  ;;  %v3387_v62 = vld [vmem:[#allocation43_spill] sm:$0xff]  ;;  %v3388_v44 = vld [vmem:[#allocation44_spill] sm:$0xff] }
 0x179   : > { %v2842_v22 = vadd.f32 %v812_v54, %v2663_v50  ;;  %v648_v41 = vadd.f32 %v3387_v62, %v488_v20  ;;  %v658_v32 = vadd.f32 %v3388_v44, %v498_v57  ;;  %v3392_v57 = vld [vmem:[#allocation33_spill] sm:$0xff] }
 0x17a   : > { %3381 = vst [vmem:[#allocation13_spill] sm:$0xff] %v2837_v59 }
 0x17b   : > { %3382 = vst [vmem:[#allocation29_spill] sm:$0xff] %v2839_v51 }
 0x17c   : > { %3383 = vst [vmem:[#allocation38_spill] sm:$0xff] %v2842_v22  ;;  %960 = vperm.xlu1 %2042, %v2452_v27   ;;  %964 = vperm.xlu2 %2040, %v3386_v25   ;;  %v3391_v22 = vld [vmem:[#allocation32_spill] sm:$0xff] }
 0x17d   : > { %2044 = vset.pattern.permute.xlu0 %v2172_v45  ;;  %v731_v53 = vpop.permute.xlu1 %730  ;;  %v771_v35 = vpop.permute.xlu2 %770  ;;  %v501_v20 = vmul.f32 %v2642_v17, %v3391_v22 }
 0x17e   : > { %v810_v50 = vmul.f32 %v2677_v21, %v731_v53  ;;  %v820_v6 = vmul.f32 %v2677_v21, %v771_v35  ;;  %1114 = vperm.xlu0 %2044, %v2403_v19   ;;  %v751_v43 = vpop.permute.xlu0 %750  ;;  %v491_v53 = vmul.f32 %v2642_v17, %v3392_v57  ;;  %v3393_v19 = vld [vmem:[#allocation21_spill] sm:$0xff] }
 0x17f   : > { %v815_v54 = vmul.f32 %v2677_v21, %v751_v43 }
 0x180   : > { %v2856_v63 = vadd.f32 %v810_v50, %v648_v41  ;;  %v2858_v59 = vadd.f32 %v820_v6, %v658_v32  ;;  %v3394_v41 = vld [vmem:[#allocation45_spill] sm:$0xff]  ;;  %v3395_v32 = vld [vmem:[#allocation46_spill] sm:$0xff] }
 0x181   : > { %v2861_v51 = vadd.f32 %v815_v54, %v2674_v23  ;;  %v651_v44 = vadd.f32 %v3394_v41, %v491_v53  ;;  %v661_v50 = vadd.f32 %v3395_v32, %v501_v20  ;;  %v3396_v53 = vld [vmem:[#allocation34_spill] sm:$0xff] }
 0x182   : > { %3389 = vst [vmem:[#allocation39_spill] sm:$0xff] %v2856_v63  ;;  %v2883_v63 = vld [vmem:[%s2294_s30 + $0x2] ss:$0 sm:$0xff]  ;;  %v494_v20 = vmul.f32 %v2642_v17, %v3396_v53 }
 0x183   : > { %3390 = vst [vmem:[#allocation25_spill] sm:$0xff] %v2858_v59 }
 0x184   : > { %972 = vperm.xlu1 %2042, %v2470_v30   ;;  %976 = vperm.xlu2 %2040, %v3393_v19  }
 0x185   : > { %v743_v35 = vpop.permute.xlu1 %742  ;;  %v783_v62 = vpop.permute.xlu2 %782 }
 0x186   : > { %v813_v23 = vmul.f32 %v2677_v21, %v743_v35  ;;  %v823_v6 = vmul.f32 %v2677_v21, %v783_v62  ;;  %1166 = vperm.xlu0 %2044, %v2470_v30   ;;  %v763_v22 = vpop.permute.xlu0 %762  ;;  %v3397_v35 = vld [vmem:[#allocation22_spill] sm:$0xff]  ;;  %v654_v30 = vadd.f32 %v2684_v29, %v494_v20 }
 0x187   : > { %v818_v43 = vmul.f32 %v2677_v21, %v763_v22 }
 0x188   : > { %v2875_v54 = vadd.f32 %v813_v23, %v651_v44  ;;  %v2877_v57 = vadd.f32 %v823_v6, %v661_v50 }
 0x189   : > { %v2880_v59 = vadd.f32 %v818_v43, %v2689_v26 }
 0x18c   : > { %984 = vperm.xlu1 %2042, %v3397_v35   ;;  %2043 = vset.pattern.permute.xlu2 %v2172_v45 }
 0x18d   : > { %v755_v62 = vpop.permute.xlu1 %754  ;;  %1110 = vperm.xlu2 %2043, %v2375_v14   ;;  %v3398_v14 = vld [vmem:[#allocation35_spill] sm:$0xff] }
 0x18e   : > { %v816_v41 = vmul.f32 %v2677_v21, %v755_v62  ;;  %1098 = vperm.xlu0 %2044, %v2357_v11   ;;  %v775_v44 = vpop.permute.xlu0 %774  ;;  %v861_v26 = vpop.permute.xlu2 %860  ;;  %v497_v29 = vmul.f32 %v2642_v17, %v3398_v14 }
 0x18f   : > { %v821_v32 = vmul.f32 %v2677_v21, %v775_v44  ;;  %v988_v50 = vmul.f32 %v2883_v63, %v861_v26 }
 0x190   : > { %v2894_v23 = vadd.f32 %v816_v41, %v654_v30  ;;  %v657_v43 = vadd.f32 %v2699_v3, %v497_v29 }
 0x191   : > { %v2897_v6 = vadd.f32 %v821_v32, %v2704_v24  ;;  %v2900_v22 = vadd.f32 %v988_v50, %v2692_v58 }
 0x194   : > { %2045 = vset.pattern.permute.xlu1 %v2172_v45 }
 0x195   : > { %1174 = vperm.xlu1 %2045, %v2488_v33   ;;  %v767_v11 = vpop.permute.xlu1 %766  ;;  %1178 = vperm.xlu2 %2043, %v3397_v35   ;;  %v3399_v35 = vld [vmem:[#allocation36_spill] sm:$0xff] }
 0x196   : > { %v819_v53 = vmul.f32 %v2677_v21, %v767_v11  ;;  %1086 = vperm.xlu0 %2044, %v2339_v8   ;;  %v787_v24 = vpop.permute.xlu0 %786  ;;  %v873_v20 = vpop.permute.xlu2 %872  ;;  %v500_v3 = vmul.f32 %v2642_v17, %v3399_v35 }
 0x197   : > { %v824_v58 = vmul.f32 %v2677_v21, %v787_v24  ;;  %v991_v62 = vmul.f32 %v2883_v63, %v873_v20 }
 0x198   : > { %v2911_v30 = vadd.f32 %v819_v53, %v657_v43  ;;  %v660_v41 = vadd.f32 %v2714_v55, %v500_v3 }
 0x199   : > { %v2914_v45 = vadd.f32 %v824_v58, %v2719_v0  ;;  %v2917_v33 = vadd.f32 %v991_v62, %v2707_v42 }
 0x19d   : > { %1102 = vperm.xlu1 %2045, %v2385_v16   ;;  %v779_v8 = vpop.permute.xlu1 %778  ;;  %1106 = vperm.xlu2 %2043, %v2380_v15  }
 0x19e   : > { %v822_v44 = vmul.f32 %v2677_v21, %v779_v8  ;;  %1154 = vperm.xlu0 %2044, %v2452_v27   ;;  %v881_v26 = vpop.permute.xlu2 %880 }
 0x19f   : > { %v993_v0 = vmul.f32 %v2883_v63, %v881_v26  ;;  %v865_v32 = vpop.permute.xlu0 %864 }
 0x1a0   : > { %v2927_v42 = vadd.f32 %v822_v44, %v660_v41  ;;  %v989_v50 = vmul.f32 %v2883_v63, %v865_v32  ;;  %v3400_v41 = vld [vmem:[#allocation23_spill] sm:$0xff]  ;;  %v3401_v44 = vld [vmem:[#allocation38_spill] sm:$0xff] }
 0x1a1   : > { %v2931_v17 = vadd.f32 %v993_v0, %v2722_v36 }
 0x1a2   : > { %v2934_v16 = vadd.f32 %v989_v50, %v2741_v7 }
 0x1a5   : > { %1170 = vperm.xlu1 %2045, %v3393_v19   ;;  %v791_v15 = vpop.permute.xlu1 %790  ;;  %1094 = vperm.xlu2 %2043, %v2362_v12  }
 0x1a6   : > { %v825_v27 = vmul.f32 %v2677_v21, %v791_v15  ;;  %1142 = vperm.xlu0 %2044, %v3378_v56   ;;  %v893_v55 = vpop.permute.xlu2 %892 }
 0x1a7   : > { %v996_v14 = vmul.f32 %v2883_v63, %v893_v55  ;;  %v885_v29 = vpop.permute.xlu0 %884 }
 0x1a8   : > { %v2942_v11 = vadd.f32 %v825_v27, %v2732_v52  ;;  %v994_v36 = vmul.f32 %v2883_v63, %v885_v29  ;;  %v3404_v27 = vld [vmem:[#allocation29_spill] sm:$0xff]  ;;  %v3406_v29 = vld [vmem:[#allocation16_spill] sm:$0xff] }
 0x1a9   : > { %v2946_v7 = vadd.f32 %v996_v14, %v2739_v40  ;;  %v3405_v14 = vld [vmem:[#allocation10_spill] sm:$0xff] }
 0x1aa   : > { %v2949_v19 = vadd.f32 %v994_v36, %v2762_v37 }
 0x1ad   : > { %1158 = vperm.xlu1 %2045, %v3386_v25   ;;  %1162 = vperm.xlu2 %2043, %v2475_v31  }
 0x1ae   : > { %1074 = vperm.xlu0 %2044, %v2321_v5   ;;  %v869_v12 = vpop.permute.xlu1 %868  ;;  %v905_v21 = vpop.permute.xlu2 %904 }
 0x1af   : > { %v990_v56 = vmul.f32 %v2883_v63, %v869_v12  ;;  %v999_v52 = vmul.f32 %v2883_v63, %v905_v21  ;;  %v897_v43 = vpop.permute.xlu0 %896 }
 0x1b0   : > { %v997_v53 = vmul.f32 %v2883_v63, %v897_v43  ;;  %v3407_v43 = vld [vmem:[#allocation39_spill] sm:$0xff] }
 0x1b1   : > { %v2958_v40 = vadd.f32 %v990_v56, %v2758_v4  ;;  %v2961_v37 = vadd.f32 %v999_v52, %v2760_v46 }
 0x1b2   : > { %v2964_v25 = vadd.f32 %v997_v53, %v2783_v60 }
 0x1b5   : > { %1090 = vperm.xlu1 %2045, %v2367_v13   ;;  %1150 = vperm.xlu2 %2043, %v2457_v28  }
 0x1b6   : > { %1062 = vperm.xlu0 %2044, %v2308_v2   ;;  %v877_v5 = vpop.permute.xlu1 %876  ;;  %v917_v31 = vpop.permute.xlu2 %916 }
 0x1b7   : > { %v992_v24 = vmul.f32 %v2883_v63, %v877_v5  ;;  %v909_v20 = vpop.permute.xlu0 %908 }
 0x1b8   : > { %v1000_v4 = vmul.f32 %v2883_v63, %v909_v20 }
 0x1b9   : > { %v2972_v58 = vadd.f32 %v992_v24, %v2779_v38  ;;  %v3409_v24 = vld [vmem:[#allocation11_spill] sm:$0xff] }
 0x1ba   : > { %v2975_v46 = vadd.f32 %v1000_v4, %v2804_v49 }
 0x1bd   : > { %1078 = vperm.xlu1 %2045, %v2349_v10   ;;  %1082 = vperm.xlu2 %2043, %v2344_v9  }
 0x1be   : > { %1130 = vperm.xlu0 %2044, %v3370_v48   ;;  %v889_v2 = vpop.permute.xlu1 %888  ;;  %v929_v13 = vpop.permute.xlu2 %928 }
 0x1bf   : > { %v995_v28 = vmul.f32 %v2883_v63, %v889_v2  ;;  %v1005_v60 = vmul.f32 %v2883_v63, %v929_v13  ;;  %v921_v62 = vpop.permute.xlu0 %920 }
 0x1c1   : > { %v2983_v35 = vadd.f32 %v995_v28, %v2800_v61  ;;  %v2986_v38 = vadd.f32 %v1005_v60, %v2802_v47  ;;  %v3410_v60 = vld [vmem:[#allocation12_spill] sm:$0xff] }
 0x1c5   : > { %1146 = vperm.xlu1 %2045, %v3379_v18   ;;  %1070 = vperm.xlu2 %2043, %v2303_v1   ;;  %v3402_v1 = vld [vmem:[#allocation14_spill] sm:$0xff] }
 0x1c6   : > { %1118 = vperm.xlu0 %2044, %v3363_v34   ;;  %v901_v9 = vpop.permute.xlu1 %900  ;;  %v941_v10 = vpop.permute.xlu2 %940  ;;  %v3403_v34 = vld [vmem:[#allocation19_spill] sm:$0xff] }
 0x1c7   : > { %v998_v49 = vmul.f32 %v2883_v63, %v901_v9  ;;  %v1008_v48 = vmul.f32 %v2883_v63, %v941_v10  ;;  %v933_v3 = vpop.permute.xlu0 %932 }
 0x1c8   : > { %v1006_v8 = vmul.f32 %v2883_v63, %v933_v3  ;;  %v3041_v3 = vld [vmem:[%s2294_s30 + $0x3] ss:$0 sm:$0xff]  ;;  %s1380_s30 = sshra.s32 %s1887_s16, 7 }
 0x1c9   : > { %v1030_v61 = vadd.f32 %v998_v49, %v2818_v39  ;;  %v2996_v47 = vadd.f32 %v1008_v48, %v3400_v41  ;;  %v1003_v41 = vmul.f32 %v2883_v63, %v921_v62  ;;  %s1905_s13 = sshll.u32 %s1380_s30, 3 }
 0x1ca   : > { %v2999_v18 = vadd.f32 %v1006_v8, %v3401_v44  ;;  %v1002_v8 = vmul.f32 %v2883_v63, %v917_v31  ;;  %s1383_s14 = scalar_lea.vmem [#allocation2], %s1905_s13 }
 0x1cd   : > { %1134 = vperm.xlu1 %2045, %v3402_v1   ;;  %1138 = vperm.xlu2 %2043, %v3403_v34   ;;  %v3411_v1 = vld [vmem:[#allocation37_spill] sm:$0xff] }
 0x1ce   : > { %v3003_v26 = vpop.permute.xlu1 %912  ;;  %v953_v0 = vpop.permute.xlu2 %952  ;;  %v1034_v34 = vadd.f32 %v1002_v8, %v3411_v1 }
 0x1cf   : > { %v1011_v32 = vmul.f32 %v2883_v63, %v953_v0  ;;  %v945_v50 = vpop.permute.xlu0 %944 }
 0x1d0   : > { %v1009_v15 = vmul.f32 %v2883_v63, %v945_v50  ;;  %v3412_v50 = vld [vmem:[#allocation24_spill] sm:$0xff] }
 0x1d1   : > { %v3008_v39 = vadd.f32 %v1011_v32, %v3404_v27 }
 0x1d2   : > { %v3011_v55 = vadd.f32 %v1009_v15, %v2861_v51  ;;  %v3408_v51 = vld [vmem:[#allocation9_spill] sm:$0xff]  ;;  %v1035_v15 = vadd.f32 %v1003_v41, %v3412_v50 }
 0x1d5   : > { %1066 = vperm.xlu1 %2045, %v3405_v14   ;;  %1126 = vperm.xlu2 %2043, %v3406_v29  }
 0x1d6   : > { %v925_v36 = vpop.permute.xlu1 %924  ;;  %v3015_v12 = vpop.permute.xlu2 %964 }
 0x1d7   : > { %v1004_v21 = vmul.f32 %v2883_v63, %v925_v36  ;;  %v957_v56 = vpop.permute.xlu0 %956 }
 0x1d8   : > { %v1012_v52 = vmul.f32 %v2883_v63, %v957_v56 }
 0x1d9   : > { %v3020_v53 = vadd.f32 %v1004_v21, %v3407_v43 }
 0x1da   : > { %v3023_v5 = vadd.f32 %v1012_v52, %v2880_v59 }
 0x1dd   : > { %1054 = vperm.xlu1 %2045, %v3408_v51   ;;  %1058 = vperm.xlu2 %2043, %v3409_v24  }
 0x1de   : > { %v937_v20 = vpop.permute.xlu1 %936  ;;  %v3027_v4 = vpop.permute.xlu2 %976 }
 0x1df   : > { %v1007_v2 = vmul.f32 %v2883_v63, %v937_v20  ;;  %v3030_v13 = vpop.permute.xlu0 %968 }
 0x1e1   : > { %v3033_v28 = vadd.f32 %v1007_v2, %v2875_v54 }
 0x1e5   : > { %1122 = vperm.xlu1 %2045, %v3410_v60  }
 0x1e6   : > { %v949_v9 = vpop.permute.xlu1 %948 }
 0x1e7   : > { %v1010_v59 = vmul.f32 %v2883_v63, %v949_v9  ;;  %v981_v10 = vpop.permute.xlu0 %980  ;;  %v1111_v49 = vpop.permute.xlu2 %1110 }
 0x1e8   : > { %v1196_v44 = vmul.f32 %v3041_v3, %v1111_v49 }
 0x1e9   : > { %v3038_v48 = vadd.f32 %v1010_v59, %v2894_v23  ;;  %v1018_v59 = vmul.f32 %v2883_v63, %v981_v10 }
 0x1ea   : > { %v1228_v27 = vadd.f32 %v1196_v44, %v1034_v34 }
 0x1eb   : > { %v1050_v50 = vadd.f32 %v1018_v59, %v2914_v45 }
 0x1ec   : > { %v1260_v29 = vmax.f32 %v1228_v27, 0.0 }
 0x1ee   : > { %v961_v54 = vpop.permute.xlu1 %960 }
 0x1ef   : > { %v1179_v0 = vpop.permute.xlu2 %1178 }
 0x1f0   : > { %v1115_v32 = vpop.permute.xlu0 %1114  ;;  %v1213_v49 = vmul.f32 %v3041_v3, %v1179_v0 }
 0x1f1   : > { %v1197_v14 = vmul.f32 %v3041_v3, %v1115_v32 }
 0x1f3   : > { %v1229_v23 = vadd.f32 %v1197_v14, %v1035_v15 }
 0x1f5   : > { %v1261_v36 = vmax.f32 %v1229_v23, 0.0  ;;  %v1013_v23 = vmul.f32 %v2883_v63, %v961_v54 }
 0x1f6   : > { %v973_v21 = vpop.permute.xlu1 %972 }
 0x1f7   : > { %v1107_v56 = vpop.permute.xlu2 %1106  ;;  %v1289_v31 = vpack.c.bf16 %v1261_v36, %v1260_v29  ;;  %v3413_v29 = vld [vmem:[#allocation13_spill] sm:$0xff]  ;;  %v1016_v45 = vmul.f32 %v2883_v63, %v973_v21  ;;  %v1017_v21 = vmul.f32 %v2883_v63, %v3027_v4 }
 0x1f8   : > { %v1167_v52 = vpop.permute.xlu0 %1166  ;;  %v1195_v0 = vmul.f32 %v3041_v3, %v1107_v56  ;;  %v1045_v56 = vadd.f32 %v1013_v23, %v2911_v30 }
 0x1f9   : > { %1342 = vmatpush.bf16.msra.mxu0 %v1289_v31  ;;  %1928 = vmatpush.bf16.msra.mxu2 %v1289_v31 }
 0x1fe   : > { %v985_v62 = vpop.permute.xlu1 %984 }
 0x1ff   : > { %v1095_v43 = vpop.permute.xlu2 %1094  ;;  %v1019_v51 = vmul.f32 %v2883_v63, %v985_v62 }
 0x200   : > { %v1192_v24 = vmul.f32 %v3041_v3, %v1095_v43  ;;  %v1099_v20 = vpop.permute.xlu0 %1098 }
 0x201   : > { %v1193_v2 = vmul.f32 %v3041_v3, %v1099_v20  ;;  %v1051_v8 = vadd.f32 %v1019_v51, %v2942_v11 }
 0x202   : > { %v1224_v60 = vadd.f32 %v1192_v24, %v1030_v61 }
 0x203   : > { %v1225_v9 = vadd.f32 %v1193_v2, %v2961_v37  ;;  %v1245_v61 = vadd.f32 %v1213_v49, %v1051_v8  ;;  %v1001_v37 = vmul.f32 %v2883_v63, %v3003_v26  ;;  %v1210_v8 = vmul.f32 %v3041_v3, %v1167_v52 }
 0x204   : > { %v1256_v41 = vmax.f32 %v1224_v60, 0.0  ;;  %v1014_v52 = vmul.f32 %v2883_v63, %v3015_v12 }
 0x205   : > { %v1257_v44 = vmax.f32 %v1225_v9, 0.0  ;;  %v1277_v11 = vmax.f32 %v1245_v61, 0.0  ;;  %v1033_v36 = vadd.f32 %v1001_v37, %v3413_v29  ;;  %v1048_v9 = vadd.f32 %v1016_v45, %v2927_v42  ;;  %v3414_v29 = vld [vmem:[#allocation25_spill] sm:$0xff] }
 0x206   : > { %v1015_v42 = vmul.f32 %v2883_v63, %v3030_v13 }
 0x207   : > { %v1175_v1 = vpop.permute.xlu1 %1174  ;;  %v1163_v34 = vpop.permute.xlu2 %1162  ;;  %v1287_v32 = vpack.c.bf16 %v1257_v44, %v1256_v41  ;;  %v1227_v51 = vadd.f32 %v1195_v0, %v1033_v36  ;;  %v1242_v37 = vadd.f32 %v1210_v8, %v1048_v9  ;;  %v1046_v36 = vadd.f32 %v1014_v52, %v3414_v29 }
 0x208   : > { %v1212_v15 = vmul.f32 %v3041_v3, %v1175_v1  ;;  %v3058_v27 = vpop.permute.xlu0 %1086 }
 0x209   : > { %v1259_v49 = vmax.f32 %v1227_v51, 0.0  ;;  %v1274_v0 = vmax.f32 %v1242_v37, 0.0 }
 0x20a   : > { %v1244_v10 = vadd.f32 %v1212_v15, %v1050_v50 }
 0x20c   : > { %v1276_v14 = vmax.f32 %v1244_v10, 0.0 }
 0x20e   : > { %v1297_v31 = vpack.c.bf16 %v1277_v11, %v1276_v14  ;;  %v1209_v14 = vmul.f32 %v3041_v3, %v1163_v34 }
 0x20f   : > { %v1103_v62 = vpop.permute.xlu1 %1102  ;;  %v1151_v43 = vpop.permute.xlu2 %1150 }
 0x210   : > { %v1194_v24 = vmul.f32 %v3041_v3, %v1103_v62  ;;  %v1206_v20 = vmul.f32 %v3041_v3, %v1151_v43  ;;  %v1155_v26 = vpop.permute.xlu0 %1154  ;;  %1361 = vmatpush.bf16.msra.mxu1 %v1297_v31  ;;  %1936 = vmatpush.bf16.msra.mxu3 %v1297_v31 }
 0x211   : > { %v1207_v2 = vmul.f32 %v3041_v3, %v1155_v26 }
 0x212   : > { %v1226_v54 = vadd.f32 %v1194_v24, %v2975_v46  ;;  %v1238_v60 = vadd.f32 %v1206_v20, %v3023_v5  ;;  %v1049_v46 = vadd.f32 %v1017_v21, %v2877_v57  ;;  %v1047_v57 = vadd.f32 %v1015_v42, %v2897_v6 }
 0x213   : > { %v1239_v59 = vadd.f32 %v1207_v2, %v1045_v56  ;;  %v1190_v24 = vmul.f32 %v3041_v3, %v3058_v27 }
 0x214   : > { %v1258_v41 = vmax.f32 %v1226_v54, 0.0  ;;  %v1270_v44 = vmax.f32 %v1238_v60, 0.0  ;;  %v1241_v62 = vadd.f32 %v1209_v14, %v1047_v57 }
 0x215   : > { %v1271_v1 = vmax.f32 %v1239_v59, 0.0  ;;  %v1222_v9 = vadd.f32 %v1190_v24, %v2946_v7 }
 0x216   : > { %v1288_v50 = vpack.c.bf16 %v1259_v49, %v1258_v41 }
 0x217   : > { %v1171_v30 = vpop.permute.xlu1 %1170  ;;  %v1083_v15 = vpop.permute.xlu2 %1082  ;;  %v1294_v61 = vpack.c.bf16 %v1271_v1, %v1270_v44 }
 0x218   : > { %v1211_v5 = vmul.f32 %v3041_v3, %v1171_v30  ;;  %v1143_v10 = vpop.permute.xlu0 %1142  ;;  %1343 = vmatpush.bf16.msra.mxu0 %v1288_v50  ;;  %1929 = vmatpush.bf16.msra.mxu2 %v1288_v50  ;;  %v1189_v8 = vmul.f32 %v3041_v3, %v1083_v15 }
 0x219   : > { %v1204_v42 = vmul.f32 %v3041_v3, %v1143_v10 }
 0x21a   : > { %v1243_v4 = vadd.f32 %v1211_v5, %v1049_v46  ;;  %v1221_v50 = vadd.f32 %v1189_v8, %v2983_v35 }
 0x21b   : > { %v1236_v57 = vadd.f32 %v1204_v42, %v3038_v48 }
 0x21c   : > { %v1275_v11 = vmax.f32 %v1243_v4, 0.0  ;;  %1344 = vmatpush.bf16.msra.mxu0 %v1287_v32  ;;  %1930 = vmatpush.bf16.msra.mxu2 %v1287_v32  ;;  %v1273_v32 = vmax.f32 %v1241_v62, 0.0  ;;  %v1253_v5 = vmax.f32 %v1221_v50, 0.0  ;;  %v1300_v62 = vld [vmem:[%s3291_s1 + $0x10] sm:$0xff] }
 0x21e   : > { %v1296_v23 = vpack.c.bf16 %v1275_v11, %v1274_v0 }
 0x21f   : > { %v1159_v31 = vpop.permute.xlu1 %1158  ;;  %v1071_v45 = vpop.permute.xlu2 %1070 }
 0x220   : > { %v1208_v13 = vmul.f32 %v3041_v3, %v1159_v31  ;;  %v1186_v43 = vmul.f32 %v3041_v3, %v1071_v45  ;;  %v1075_v51 = vpop.permute.xlu0 %1074  ;;  %1362 = vmatpush.bf16.msra.mxu1 %v1296_v23  ;;  %1937 = vmatpush.bf16.msra.mxu3 %v1296_v23 }
 0x221   : > { %v1187_v63 = vmul.f32 %v3041_v3, %v1075_v51 }
 0x222   : > { %v1240_v12 = vadd.f32 %v1208_v13, %v1046_v36  ;;  %v1218_v34 = vadd.f32 %v1186_v43, %v2972_v58  ;;  %v1254_v58 = vmax.f32 %v1222_v9, 0.0 }
 0x223   : > { %v1219_v6 = vadd.f32 %v1187_v63, %v2931_v17  ;;  %v2173_v63 = vmov 5  }
 0x224   : > { %v1272_v20 = vmax.f32 %v1240_v12, 0.0  ;;  %v1250_v26 = vmax.f32 %v1218_v34, 0.0  ;;  %2047 = vset.pattern.permute.xlu0 %v2173_v63  ;;  %2048 = vset.pattern.permute.xlu1 %v2173_v63 }
 0x225   : > { %v1251_v56 = vmax.f32 %v1219_v6, 0.0  ;;  %1314 = vperm.xlu1 %2048, %v1300_v62   ;;  %2046 = vset.pattern.permute.xlu2 %v2173_v63 }
 0x226   : > { %v1295_v2 = vpack.c.bf16 %v1273_v32, %v1272_v20 }
 0x227   : > { %v1091_v54 = vpop.permute.xlu1 %1090  ;;  %v1139_v60 = vpop.permute.xlu2 %1138  ;;  %v1284_v21 = vpack.c.bf16 %v1251_v56, %v1250_v26 }
 0x228   : > { %v1191_v59 = vmul.f32 %v3041_v3, %v1091_v54  ;;  %v1063_v49 = vpop.permute.xlu0 %1062  ;;  %1363 = vmatpush.bf16.msra.mxu1 %v1295_v2  ;;  %1938 = vmatpush.bf16.msra.mxu3 %v1295_v2  ;;  %v1301_v2 = vld [vmem:[%s3291_s1 + $0x18] sm:$0xff] }
 0x229   : > { %v1184_v43 = vmul.f32 %v3041_v3, %v1063_v49  ;;  %v1923_v49 = vld [vmem:[%s3292_s2 + $0x4] sm:$0xf0] }
 0x22a   : > { %v1223_v17 = vadd.f32 %v1191_v59, %v2964_v25  ;;  %v1891_v59 = vld [vmem:[%s3292_s2] sm:$0xf] }
 0x22b   : > { %v1216_v34 = vadd.f32 %v1184_v43, %v2958_v40 }
 0x22c   : > { %v1255_v27 = vmax.f32 %v1223_v17, 0.0  ;;  %1364 = vmatpush.bf16.msra.mxu1 %v1294_v61  ;;  %1939 = vmatpush.bf16.msra.mxu3 %v1294_v61 }
 0x22d   : > { %v1248_v20 = vmax.f32 %v1216_v34, 0.0  ;;  %v1390_v34 = vld [vmem:[#allocation3 + $0x10] sm:$0xff] }
 0x22e   : > { %v1286_v41 = vpack.c.bf16 %v1255_v27, %v1254_v58 }
 0x22f   : > { %v1079_v44 = vpop.permute.xlu1 %1078  ;;  %v1127_v1 = vpop.permute.xlu2 %1126 }
 0x230   : > { %v1188_v7 = vmul.f32 %v3041_v3, %v1079_v44  ;;  %v1200_v30 = vmul.f32 %v3041_v3, %v1127_v1  ;;  %v1131_v46 = vpop.permute.xlu0 %1130  ;;  %1345 = vmatpush.bf16.msra.mxu0 %v1286_v41  ;;  %1931 = vmatpush.bf16.msra.mxu2 %v1286_v41  ;;  %v1892_v44 = vor.u32 %v1923_v49, %v1891_v59 }
 0x231   : > { %v1201_v25 = vmul.f32 %v3041_v3, %v1131_v46  ;;  %v1922_v46 = vld [vmem:[%s3292_s2 + $0x4] sm:$0xf] }
 0x232   : > { %v1220_v37 = vadd.f32 %v1188_v7, %v2949_v19  ;;  %v1232_v15 = vadd.f32 %v1200_v30, %v2999_v18  ;;  %v1268_v18 = vmax.f32 %v1236_v57, 0.0 }
 0x233   : > { %v1233_v61 = vadd.f32 %v1201_v25, %v3033_v28  ;;  %v1203_v28 = vmul.f32 %v3041_v3, %v1139_v60  ;;  %v1893_v25 = vld [vmem:[%s3292_s2 + $0x8] sm:$0xf0] }
 0x234   : > { %v1252_v4 = vmax.f32 %v1220_v37, 0.0  ;;  %v1264_v35 = vmax.f32 %v1232_v15, 0.0 }
 0x235   : > { %v1265_v52 = vmax.f32 %v1233_v61, 0.0  ;;  %v1235_v31 = vadd.f32 %v1203_v28, %v3011_v55  ;;  %v1298_v55 = vld [vmem:[%s3291_s1] sm:$0xff]  ;;  %v1896_v61 = vor.u32 %v1922_v46, %v1893_v25 }
 0x236   : > { %v1285_v0 = vpack.c.bf16 %v1253_v5, %v1252_v4  ;;  %1304 = vperm.xlu2 %2046, %v1298_v55   ;;  %v1388_v55 = vld [vmem:[#allocation3] sm:$0xff] }
 0x237   : > { %v1147_v14 = vpop.permute.xlu1 %1146  ;;  %v1291_v11 = vpack.c.bf16 %v1265_v52, %v1264_v35  ;;  %v1267_v13 = vmax.f32 %v1235_v31, 0.0  ;;  %v1059_v32 = vpop.permute.xlu2 %1058 }
 0x238   : > { %v1205_v23 = vmul.f32 %v3041_v3, %v1147_v14  ;;  %1346 = vmatpush.bf16.msra.mxu0 %v1285_v0  ;;  %1932 = vmatpush.bf16.msra.mxu2 %v1285_v0  ;;  %v1183_v26 = vmul.f32 %v3041_v3, %v1059_v32  ;;  %v1409_v32 = vld [vmem:[#allocation4] sm:$0xff] }
 0x23a   : > { %v1237_v19 = vadd.f32 %v1205_v23, %v3008_v39  ;;  %v1299_v39 = vld [vmem:[%s3291_s1 + $0x8] sm:$0xff]  ;;  %v1215_v40 = vadd.f32 %v1183_v26, %v2934_v16  ;;  %v1899_v16 = vld [vmem:[%s3292_s2 + $0x10] sm:$0xf] }
 0x23b   : > { %1309 = vperm.xlu0 %2047, %v1299_v39  }
 0x23c   : > { %v1269_v29 = vmax.f32 %v1237_v19, 0.0  ;;  %1347 = vmatpush.bf16.msra.mxu0 %v1284_v21  ;;  %1933 = vmatpush.bf16.msra.mxu2 %v1284_v21  ;;  %v1247_v17 = vmax.f32 %v1215_v40, 0.0 }
 0x23e   : > { %v1293_v10 = vpack.c.bf16 %v1269_v29, %v1268_v18  ;;  %1319 = vperm.xlu2 %2046, %v1301_v2  }
 0x23f   : > { %v1135_v36 = vpop.permute.xlu1 %1134 }
 0x240   : > { %v1202_v45 = vmul.f32 %v3041_v3, %v1135_v36  ;;  %1365 = vmatpush.bf16.msra.mxu1 %v1293_v10  ;;  %1940 = vmatpush.bf16.msra.mxu3 %v1293_v10 }
 0x242   : > { %v1234_v48 = vadd.f32 %v1202_v45, %v2996_v47 }
 0x244   : > { %v1266_v51 = vmax.f32 %v1234_v48, 0.0 }
 0x246   : > { %v1292_v47 = vpack.c.bf16 %v1267_v13, %v1266_v51 }
 0x247   : > { %v1067_v12 = vpop.permute.xlu1 %1066 }
 0x248   : > { %v1185_v6 = vmul.f32 %v3041_v3, %v1067_v12  ;;  %1366 = vmatpush.bf16.msra.mxu1 %v1292_v47  ;;  %1941 = vmatpush.bf16.msra.mxu3 %v1292_v47 }
 0x24a   : > { %v1217_v24 = vadd.f32 %v1185_v6, %v2917_v33  ;;  %v1119_v33 = vpop.permute.xlu0 %1118 }
 0x24b   : > { %v1198_v58 = vmul.f32 %v3041_v3, %v1119_v33  ;;  %v1391_v33 = vld [vmem:[#allocation3 + $0x18] sm:$0xff] }
 0x24c   : > { %v1249_v56 = vmax.f32 %v1217_v24, 0.0  ;;  %1367 = vmatpush.bf16.msra.mxu1 %v1291_v11  ;;  %1942 = vmatpush.bf16.msra.mxu3 %v1291_v11  ;;  %v1389_v24 = vld [vmem:[#allocation3 + $0x8] sm:$0xff] }
 0x24d   : > { %v1230_v50 = vadd.f32 %v1198_v58, %v3020_v53  ;;  %v1924_v53 = vld [vmem:[%s3292_s2 + $0x14] sm:$0xf] }
 0x24e   : > { %v1283_v54 = vpack.c.bf16 %v1249_v56, %v1248_v20 }
 0x24f   : > { %v1055_v60 = vpop.permute.xlu1 %1054  ;;  %v1262_v37 = vmax.f32 %v1230_v50, 0.0 }
 0x250   : > { %v1182_v21 = vmul.f32 %v3041_v3, %v1055_v60  ;;  %1348 = vmatpush.bf16.msra.mxu0 %v1283_v54  ;;  %1934 = vmatpush.bf16.msra.mxu2 %v1283_v54  ;;  %v1411_v60 = vld [vmem:[#allocation4 + $0x10] sm:$0xff] }
 0x252   : > { %v1214_v9 = vadd.f32 %v1182_v21, %v2900_v22  ;;  %v1925_v22 = vld [vmem:[%s3292_s2 + $0x14] sm:$0xf0] }
 0x253   : > { %v1900_v1 = vor.u32 %v1925_v22, %v1899_v16  ;;  %v1412_v21 = vld [vmem:[#allocation4 + $0x18] sm:$0xff] }
 0x254   : > { %v1246_v8 = vmax.f32 %v1214_v9, 0.0 }
 0x256   : > { %v1282_v27 = vpack.c.bf16 %v1247_v17, %v1246_v8  ;;  %v1410_v8 = vld [vmem:[#allocation4 + $0x8] sm:$0xff] }
 0x257   : > { %v1123_v41 = vpop.permute.xlu1 %1122 }
 0x258   : > { %v1199_v7 = vmul.f32 %v3041_v3, %v1123_v41  ;;  %1349 = vmatpush.bf16.msra.mxu0 %v1282_v27  ;;  %1935 = vmatpush.bf16.msra.mxu2 %v1282_v27 }
 0x25a   : > { %v1231_v30 = vadd.f32 %v1199_v7, %v2986_v38  ;;  %v1901_v38 = vld [vmem:[%s3292_s2 + $0x18] sm:$0xf0] }
 0x25b   : > { %1350 = vmatmul.bf16.vlgmr.msra.gmra.mxu0 %v1892_v44  ;;  %1355 = vmatmul.bf16.vlgmr.msra.gmra.mxu2 %v1900_v1  ;;  %v1904_v5 = vor.u32 %v1924_v53, %v1901_v38 }
 0x25c   : > { %v1263_v15 = vmax.f32 %v1231_v30, 0.0 }
 0x25e   : > { %v1290_v3 = vpack.c.bf16 %v1263_v15, %v1262_v37 }
 0x260   : > { %1368 = vmatpush.bf16.msra.mxu1 %v1290_v3  ;;  %1943 = vmatpush.bf16.msra.mxu3 %v1290_v3 }
 0x263   : > { %1369 = vmatmul.bf16.vlgmr.msra.gmra.mxu1 %v1896_v61  ;;  %1374 = vmatmul.bf16.vlgmr.msra.gmra.mxu3 %v1904_v5 }
 0x290   : > { %v1305_v4 = vpop.permute.xlu2 %1304 }
 0x297   : > { %v1315_v52 = vpop.permute.xlu1 %1314 }
 0x298   : > { %v1320_v45 = vpop.permute.xlu2 %1319 }
 0x2ad   : > { %v1310_v19 = vpop.permute.xlu0 %1309 }
 0x2d8   : > { %v1351_v42 = vpop.f32.mrf.mxu0 }
 0x2d9   : > { %v1352_v35 = vadd.f32 %v1351_v42, %v1305_v4 }
 0x2de   : > { %v1356_v0 = vpop.f32.mrf.mxu2 }
 0x2df   : > { %v1357_v57 = vadd.f32 %v1356_v0, %v1315_v52 }
 0x2e0   : > { %v1370_v14 = vpop.f32.mrf.mxu1  ;;  %v1353_v23 = vpop.f32.mrf.mxu0 }
 0x2e1   : > { %v1371_v11 = vadd.f32 %v1370_v14, %v1352_v35  ;;  %v1354_v28 = vadd.f32 %v1353_v23, %v1310_v19 }
 0x2e3   : > { %1384 = vst [vmem:[%s1383_s14] sm:$0xff] %v1371_v11  ;;  %1392 = vadd.xlane.f32.xlu1 %v1371_v11  ;;  %v1413_v31 = vmul.f32 %v1371_v11, %v1371_v11 }
 0x2e6   : > { %v1375_v18 = vpop.f32.mrf.mxu3  ;;  %v1358_v48 = vpop.f32.mrf.mxu2 }
 0x2e7   : > { %v1376_v29 = vadd.f32 %v1375_v18, %v1357_v57  ;;  %v1359_v39 = vadd.f32 %v1358_v48, %v1320_v45 }
 0x2e8   : > { %v1372_v10 = vpop.f32.mrf.mxu1 }
 0x2e9   : > { %1386 = vst [vmem:[%s1383_s14 + $0x20] sm:$0xff] %v1376_v29  ;;  %v1373_v36 = vadd.f32 %v1372_v10, %v1354_v28  ;;  %1396 = vadd.xlane.f32.xlu0 %v1376_v29  ;;  %v1415_v43 = vmul.f32 %v1376_v29, %v1376_v29 }
 0x2eb   : > { %1385 = vst [vmem:[%s1383_s14 + $0x10] sm:$0xff] %v1373_v36  ;;  %1417 = vadd.xlane.f32.xlu1 %v1413_v31  ;;  %1394 = vadd.xlane.f32.xlu2 %v1373_v36  ;;  %v1414_v63 = vmul.f32 %v1373_v36, %v1373_v36 }
 0x2ee   : > { %v1377_v62 = vpop.f32.mrf.mxu3 }
 0x2ef   : > { %v1378_v13 = vadd.f32 %v1377_v62, %v1359_v39 }
 0x2f1   : > { %1387 = vst [vmem:[%s1383_s14 + $0x30] sm:$0xff] %v1378_v13  ;;  %1421 = vadd.xlane.f32.xlu0 %v1415_v43  ;;  %v1416_v51 = vmul.f32 %v1378_v13, %v1378_v13 }
 0x2f3   : > { %1423 = vadd.xlane.f32.xlu1 %v1416_v51  ;;  %1398 = vadd.xlane.f32.xlu2 %v1378_v13 }
 0x2fb   : > { %1419 = vadd.xlane.f32.xlu2 %v1414_v63 }
 0x356   : > { %v1393_v47 = vpop.xlane.xlu1 %1392 }
 0x357   : > { %v1400_v12 = vadd.f32 %v1393_v47, %v1388_v55 }
 0x359   : > { %1405 = vst.msk [vmem:[#allocation3] sm:$0xff] %vm1404_vm1, %v1400_v12 }
 0x35c   : > { %v1397_v6 = vpop.xlane.xlu0 %1396 }
 0x35d   : > { %v1402_v20 = vadd.f32 %v1397_v6, %v1390_v34 }
 0x35e   : > { %v1418_v26 = vpop.xlane.xlu1 %1417  ;;  %v1395_v56 = vpop.xlane.xlu2 %1394 }
 0x35f   : > { %1407 = vst.msk [vmem:[#allocation3 + $0x10] sm:$0xff] %vm1404_vm1, %v1402_v20  ;;  %v1425_v2 = vadd.f32 %v1418_v26, %v1409_v32  ;;  %v1401_v54 = vadd.f32 %v1395_v56, %v1389_v24 }
 0x361   : > { %1429 = vst.msk [vmem:[#allocation4] sm:$0xff] %vm1404_vm1, %v1425_v2 }
 0x362   : > { %1406 = vst.msk [vmem:[#allocation3 + $0x8] sm:$0xff] %vm1404_vm1, %v1401_v54 }
 0x364   : > { %v1422_v40 = vpop.xlane.xlu0 %1421 }
 0x365   : > { %v1427_v9 = vadd.f32 %v1422_v40, %v1411_v60 }
 0x366   : > { %v1424_v59 = vpop.xlane.xlu1 %1423  ;;  %v1399_v49 = vpop.xlane.xlu2 %1398 }
 0x367   : > { %1431 = vst.msk [vmem:[#allocation4 + $0x10] sm:$0xff] %vm1404_vm1, %v1427_v9  ;;  %v1428_v17 = vadd.f32 %v1424_v59, %v1412_v21  ;;  %v1403_v58 = vadd.f32 %v1399_v49, %v1391_v33 }
 0x369   : > { %1432 = vst.msk [vmem:[#allocation4 + $0x18] sm:$0xff] %vm1404_vm1, %v1428_v17 }
 0x36a   : > { %1408 = vst.msk [vmem:[#allocation3 + $0x18] sm:$0xff] %vm1404_vm1, %v1403_v58 }
 0x36e   : > { %v1420_v16 = vpop.xlane.xlu2 %1419 }
 0x36f   : > { %v1426_v22 = vadd.f32 %v1420_v16, %v1410_v8 }
 0x371   : > { %1430 = vst.msk [vmem:[#allocation4 + $0x8] sm:$0xff] %vm1404_vm1, %v1426_v22 }
 0x372 PF: > { %p1906_p3 = scmp.ne.s32.totalorder %s2153_s22, 1 }
 0x373   : > { %s2174_s15 = smov (!%p1906_p3), 6   ;;  %s2175_s30 = smov (!%p1906_p3), 122  }
 0x374   : > { %1436 = sbr.rel (%p1906_p3) target bundleno = 1551 (0x60f), region = 48  ;;  %s2177_s26 = smov (!%p1906_p3), 7  }
 0x375   : > { %s1573_s27 = sshra.s32 (!%p1906_p3), %s1887_s16, 7 }
 0x376   : > { %s1907_s10 = sshll.u32 (!%p1906_p3), %s1573_s27, 3 }
 0x379   : > { %v1439_v27 = vld [vmem:[#allocation3 + $0x10] sm:$0xff]  ;;  %v1437_v44 = vld [vmem:[#allocation3] sm:$0xff]  ;;  %v1440_v46 = vld [vmem:[#allocation3 + $0x18] sm:$0xff]  ;;  %vm1665_vm14 = vcmask 261120  }
 0x37a   : > { %v1447_v41 = vld [vmem:[#allocation4 + $0x10] sm:$0xff]  ;;  %v3170_v1 = vmul.f32 0.00390625, %v1439_v27  ;;  %v3172_v7 = vmul.f32 0.00390625, %v1437_v44  ;;  %v1445_v30 = vld [vmem:[#allocation4] sm:$0xff]  ;;  %v1448_v25 = vld [vmem:[#allocation4 + $0x18] sm:$0xff]  ;;  %v3174_v15 = vmul.f32 0.00390625, %v1440_v46 }
 0x37b   : > { %v1451_v50 = vmul.f32 0.00390625, %v1447_v41  ;;  %v1449_v37 = vmul.f32 0.00390625, %v1445_v30  ;;  %v1452_v53 = vmul.f32 0.00390625, %v1448_v25  ;;  %v1438_v38 = vld [vmem:[#allocation3 + $0x8] sm:$0xff]  ;;  %v3189_v58 = vld [vmem:[%s3291_s1 + $0x10] sm:$0xff]  ;;  %v3194_v8 = vld [vmem:[%s3291_s1] sm:$0xff] }
 0x37c   : > { %v1446_v3 = vld [vmem:[#allocation4 + $0x8] sm:$0xff]  ;;  %v1455_v61 = vmul.f32 %v3170_v1, %v3170_v1  ;;  %v1453_v5 = vmul.f32 %v3172_v7, %v3172_v7  ;;  %v3180_v42 = vmul.f32 0.00390625, %v1438_v38  ;;  %v1456_v35 = vmul.f32 %v3174_v15, %v3174_v15  ;;  %v3201_v44 = vld [vmem:[%s3291_s1 + $0x18] sm:$0xff] }
 0x37d   : > { %v1450_v4 = vmul.f32 0.00390625, %v1446_v3 }
 0x37e   : > { %v1459_v52 = vsub.f32 %v1451_v50, %v1455_v61  ;;  %v1457_v0 = vsub.f32 %v1449_v37, %v1453_v5  ;;  %v1454_v14 = vmul.f32 %v3180_v42, %v3180_v42  ;;  %v1460_v11 = vsub.f32 %v1452_v53, %v1456_v35  ;;  %v1466_v50 = vld [vmem:[%s3291_s1 + $0x8] sm:$0xff] }
 0x37f   : > { %v2176_v53 = vmov 6  }
 0x380   : > { %v1463_v57 = vmax.f32 %v1459_v52, 0.0  ;;  %v1461_v23 = vmax.f32 %v1457_v0, 0.0  ;;  %v1458_v19 = vsub.f32 %v1450_v4, %v1454_v14  ;;  %v1464_v18 = vmax.f32 %v1460_v11, 0.0  ;;  %2053 = vset.pattern.permute.xlu0 %v2176_v53  ;;  %2054 = vset.pattern.permute.xlu1 %v2176_v53 }
 0x381   : > { %2055 = vset.pattern.permute.xlu2 %v2176_v53 }
 0x382   : > { %v1471_v28 = vadd.f32 1e-05, %v1463_v57  ;;  %v1469_v29 = vadd.f32 1e-05, %v1461_v23  ;;  %v1462_v10 = vmax.f32 %v1458_v19, 0.0 }
 0x383   : > { %v1472_v36 = vadd.f32 1e-05, %v1464_v18 }
 0x384   : > { %2061 = vrsqrt.f32 %v1471_v28  ;;  %v1470_v31 = vadd.f32 1e-05, %v1462_v10  ;;  %vm1499_vm2 = vweird.f32 %v1471_v28  ;;  %vm1479_vm4 = vweird.f32 %v1469_v29 }
 0x385   : > { %2063 = vrsqrt.f32 %v1469_v29  ;;  %vm1509_vm8 = vweird.f32 %v1472_v36 }
 0x386   : > { %2065 = vrsqrt.f32 %v1472_v36  ;;  %vm1489_vm10 = vweird.f32 %v1470_v31 }
 0x387   : > { %2067 = vrsqrt.f32 %v1470_v31 }
 0x38a   : > { %v2062_v45 = vpop.eup %2061 }
 0x38b   : > { %v2064_v48 = vpop.eup %2063  ;;  %v1494_v39 = vmul.f32 %v2062_v45, %v1471_v28  ;;  %vm1500_vm3 = vweird.f32 %v2062_v45 }
 0x38c   : > { %v2066_v62 = vpop.eup %2065  ;;  %v1474_v13 = vmul.f32 %v2064_v48, %v1469_v29  ;;  %vm1480_vm5 = vweird.f32 %v2064_v48  ;;  %vm1501_vm6 = vmor %vm1499_vm2, %vm1500_vm3 }
 0x38d   : > { %v2068_v43 = vpop.eup %2067  ;;  %v1495_v51 = vmul.f32 %v2062_v45, %v1494_v39  ;;  %v1504_v63 = vmul.f32 %v2066_v62, %v1472_v36  ;;  %vm1481_vm7 = vmor %vm1479_vm4, %vm1480_vm5  ;;  %vm1510_vm9 = vweird.f32 %v2066_v62 }
 0x38e   : > { %v1475_v55 = vmul.f32 %v2064_v48, %v1474_v13  ;;  %v1484_v47 = vmul.f32 %v2068_v43, %v1470_v31  ;;  %vm1490_vm11 = vweird.f32 %v2068_v43  ;;  %vm1511_vm12 = vmor %vm1509_vm8, %vm1510_vm9 }
 0x38f   : > { %v1496_v12 = vmul.f32 0.5, %v1495_v51  ;;  %v1505_v34 = vmul.f32 %v2066_v62, %v1504_v63  ;;  %vm1491_vm13 = vmor %vm1489_vm10, %vm1490_vm11 }
 0x390   : > { %v1476_v6 = vmul.f32 0.5, %v1475_v55  ;;  %v1485_v32 = vmul.f32 %v2068_v43, %v1484_v47 }
 0x391   : > { %v1497_v24 = vsub.f32 1.5, %v1496_v12  ;;  %v1506_v20 = vmul.f32 0.5, %v1505_v34 }
 0x392   : > { %v1477_v26 = vsub.f32 1.5, %v1476_v6  ;;  %v1486_v56 = vmul.f32 0.5, %v1485_v32 }
 0x393   : > { %v1498_v2 = vmul.f32 %v2062_v45, %v1497_v24  ;;  %v1507_v54 = vsub.f32 1.5, %v1506_v20 }
 0x394   : > { %v1478_v60 = vmul.f32 %v2064_v48, %v1477_v26  ;;  %v1487_v40 = vsub.f32 1.5, %v1486_v56 }
 0x395   : > { %v1502_v21 = vsel %vm1501_vm6, %v2062_v45, %v1498_v2  ;;  %v1508_v9 = vmul.f32 %v2066_v62, %v1507_v54  ;;  %v2179_v45 = vmov 8  }
 0x396   : > { %1521 = vrot.lane.b32.xlu0 %v1502_v21, %s2174_s15  ;;  %v1482_v33 = vsel %vm1481_vm7, %v2064_v48, %v1478_v60  ;;  %v1488_v59 = vmul.f32 %v2068_v43, %v1487_v40  ;;  %v1926_v40 = vld [vmem:[%s3293_s3] sm:$0xff]  ;;  %v1927_v21 = vld [vmem:[%s3293_s3 + $0x8] sm:$0xff] }
 0x397   : > { %1517 = vrot.lane.b32.xlu1 %v1482_v33, %s2174_s15  ;;  %v1512_v49 = vsel %vm1511_vm12, %v2066_v62, %v1508_v9 }
 0x398   : > { %v1492_v17 = vsel %vm1491_vm13, %v2068_v43, %v1488_v59 }
 0x39e   : > { %1523 = vrot.lane.b32.xlu0 %v1512_v49, %s2174_s15 }
 0x39f   : > { %1519 = vrot.lane.b32.xlu1 %v1492_v17, %s2174_s15 }
 0x408   : > { %v1522_v16 = vpop.permute.xlu0 %1521 }
 0x409   : > { %v1531_v22 = vmul.f32 %v1522_v16, %v3189_v58  ;;  %v1518_v27 = vpop.permute.xlu1 %1517  ;;  %v2180_v16 = vmov 32.0  }
 0x40a   : > { %v1529_v41 = vmul.f32 %v1518_v27, %v3194_v8  ;;  %2069 = vrcp.f32 %v2180_v16 }
 0x40b   : > { %1541 = vrot.lane.b32.xlu2 %v1531_v22, %s2175_s30 }
 0x40c   : > { %1537 = vrot.lane.b32.xlu0 %v1529_v41, %s2175_s30 }
 0x410   : > { %v1524_v30 = vpop.permute.xlu0 %1523 }
 0x411   : > { %v1532_v46 = vmul.f32 %v1524_v30, %v3201_v44  ;;  %v1520_v25 = vpop.permute.xlu1 %1519 }
 0x412   : > { %v1530_v37 = vmul.f32 %v1520_v25, %v1466_v50 }
 0x413   : > { %1543 = vrot.lane.b32.xlu2 %v1532_v46, %s2175_s30 }
 0x414   : > { %1539 = vrot.lane.b32.xlu1 %v1530_v37, %s2175_s30  ;;  %s1576_s30 = scalar_lea.vmem [#allocation2], %s1907_s10 }
 0x415   : > { %v1579_v29 = vld [vmem:[%s1576_s30 + $0x20] sm:$0xff]  ;;  %v1580_v36 = vld [vmem:[%s1576_s30 + $0x30] sm:$0xff] }
 0x416   : > { %v1578_v47 = vld [vmem:[%s1576_s30 + $0x10] sm:$0xff]  ;;  %v1577_v34 = vld [vmem:[%s1576_s30] sm:$0xff] }
 0x465   : > { %v1542_v38 = vpop.permute.xlu2 %1541 }
 0x466   : > { %v1551_v3 = vmul.f32 %v1542_v38, %v3170_v1  ;;  %v2178_v1 = vmov 7  }
 0x468   : > { %1561 = vrot.lane.b32.xlu2 %v1551_v3, %s2177_s26 }
 0x46d   : > { %v1544_v61 = vpop.permute.xlu2 %1543 }
 0x46e   : > { %v1552_v5 = vmul.f32 %v1544_v61, %v3174_v15 }
 0x470   : > { %1563 = vrot.lane.b32.xlu0 %v1552_v5, %s2177_s26 }
 0x478   : > { %1590 = vperm.xlu0 %2053, %v1531_v22   ;;  %v2070_v22 = vpop.eup %2069 }
 0x479   : > { %vm1709_vm15 = vweird.f32 %v2070_v22 }
 0x47e   : > { %v1538_v4 = vpop.permute.xlu0 %1537 }
 0x47f   : > { %v1549_v35 = vmul.f32 %v1538_v4, %v3172_v7 }
 0x480   : > { %1586 = vperm.xlu0 %2053, %v1530_v37  }
 0x481   : > { %1557 = vrot.lane.b32.xlu1 %v1549_v35, %s2177_s26 }
 0x486   : > { %v1540_v52 = vpop.permute.xlu1 %1539 }
 0x487   : > { %v1550_v0 = vmul.f32 %v1540_v52, %v3180_v42 }
 0x488   : > { %2058 = vset.pattern.permute.xlu0 %v2179_v45 }
 0x489   : > { %1594 = vperm.xlu1 %2054, %v1532_v46   ;;  %1559 = vrot.lane.b32.xlu2 %v1550_v0, %s2177_s26  ;;  %v1705_v46 = vmul.f32 32.0, %v2070_v22 }
 0x48a   : > { %1637 = vperm.xlu0 %2058, %v3194_v8  }
 0x48b   : > { %v1706_v53 = vsub.f32 1.0, %v1705_v46 }
 0x48d   : > { %v1707_v61 = vmul.f32 %v2070_v22, %v1706_v53 }
 0x48f   : > { %v1708_v35 = vadd.f32 %v2070_v22, %v1707_v61 }
 0x491   : > { %1582 = vperm.xlu2 %2055, %v1529_v41   ;;  %2057 = vset.pattern.permute.xlu1 %v2178_v1 }
 0x499   : > { %2056 = vset.pattern.permute.xlu2 %v2178_v1  ;;  %v1710_v1 = vsel %vm1709_vm15, %v2070_v22, %v1708_v35 }
 0x4c2   : > { %v1562_v14 = vpop.permute.xlu2 %1561 }
 0x4c3   : > { %v1571_v15 = vsub.f32 %v3189_v58, %v1562_v14 }
 0x4c5   : > { %1613 = vperm.xlu2 %2056, %v1571_v15  }
 0x4e2   : > { %v1564_v11 = vpop.permute.xlu0 %1563 }
 0x4e3   : > { %v1572_v57 = vsub.f32 %v3201_v44, %v1564_v11  ;;  %v1560_v7 = vpop.permute.xlu2 %1559 }
 0x4e4   : > { %v1570_v23 = vsub.f32 %v1466_v50, %v1560_v7 }
 0x4e5   : > { %1618 = vperm.xlu1 %2057, %v1572_v57  }
 0x4e6   : > { %1608 = vperm.xlu2 %2056, %v1570_v23  }
 0x4ea   : > { %v1591_v10 = vpop.permute.xlu0 %1590 }
 0x4eb   : > { %v1583_v18 = vpop.permute.xlu2 %1582  ;;  %v1599_v48 = vmul.f32 %v1591_v10, %v1579_v29 }
 0x4ec   : > { %v1597_v24 = vmul.f32 %v1583_v18, %v1577_v34 }
 0x4ee   : > { %2060 = vset.pattern.permute.xlu2 %v2179_v45 }
 0x4ef   : > { %1647 = vperm.xlu2 %2060, %v3189_v58  }
 0x4f2   : > { %v1587_v12 = vpop.permute.xlu0 %1586 }
 0x4f3   : > { %v1558_v19 = vpop.permute.xlu1 %1557  ;;  %v1598_v32 = vmul.f32 %v1587_v12, %v1578_v47 }
 0x4f4   : > { %v1569_v42 = vsub.f32 %v3194_v8, %v1558_v19 }
 0x4f6   : > { %1603 = vperm.xlu1 %2057, %v1569_v42  }
 0x4fb   : > { %v1595_v28 = vpop.permute.xlu1 %1594 }
 0x4fc   : > { %v1600_v39 = vmul.f32 %v1595_v28, %v1580_v36  ;;  %v1638_v9 = vpop.permute.xlu0 %1637 }
 0x4fe   : > { %2059 = vset.pattern.permute.xlu1 %v2179_v45 }
 0x4ff   : > { %1642 = vperm.xlu1 %2059, %v1466_v50  }
 0x507   : > { %1652 = vperm.xlu1 %2059, %v3201_v44  }
 0x51f   : > { %v1614_v31 = vpop.permute.xlu2 %1613 }
 0x520   : > { %v1623_v62 = vadd.f32 %v1614_v31, %v1599_v48 }
 0x522   : > { %v1627_v51 = vmax.f32 %v1623_v62, 0.0 }
 0x540   : > { %v1609_v6 = vpop.permute.xlu2 %1608 }
 0x541   : > { %v1622_v20 = vadd.f32 %v1609_v6, %v1598_v32 }
 0x543   : > { %v1626_v2 = vmax.f32 %v1622_v20, 0.0 }
 0x549   : > { %v1648_v59 = vpop.permute.xlu2 %1647 }
 0x557   : > { %v1619_v13 = vpop.permute.xlu1 %1618 }
 0x558   : > { %v1624_v43 = vadd.f32 %v1619_v13, %v1600_v39 }
 0x55a   : > { %v1628_v63 = vmax.f32 %v1624_v43, 0.0 }
 0x55c   : > { %v1634_v55 = vpack.c.bf16 %v1628_v63, %v1627_v51 }
 0x55e   : > { %1678 = vmatpush.bf16.msra.mxu0 %v1634_v55  ;;  %1944 = vmatpush.bf16.msra.mxu1 %v1634_v55 }
 0x568   : > { %v1604_v26 = vpop.permute.xlu1 %1603 }
 0x569   : > { %v1621_v56 = vadd.f32 %v1604_v26, %v1597_v24 }
 0x56b   : > { %v1625_v54 = vmax.f32 %v1621_v56, 0.0 }
 0x56d   : > { %v1633_v60 = vpack.c.bf16 %v1626_v2, %v1625_v54 }
 0x56f   : > { %1679 = vmatpush.bf16.msra.mxu0 %v1633_v60  ;;  %1945 = vmatpush.bf16.msra.mxu1 %v1633_v60 }
 0x571   : > { %v1643_v33 = vpop.permute.xlu1 %1642 }
 0x572   : > { %1916 = vmatmul.msk.bf16.vlgmr.msra.gmra.mxu0 %vm1665_vm14, %v1926_v40  ;;  %1917 = vmatmul.msk.bf16.vlgmr.msra.gmra.mxu1 %vm1665_vm14, %v1927_v21 }
 0x579   : > { %v1653_v27 = vpop.permute.xlu1 %1652 }
 0x5ef   : > { %v1681_v49 = vpop.f32.mrf.mxu0  ;;  %v1686_v17 = vpop.f32.mrf.mxu1 }
 0x5f0   : > { %v1682_v58 = vadd.f32 %v1681_v49, %v1638_v9  ;;  %v1687_v8 = vadd.f32 %v1686_v17, %v1648_v59 }
 0x5f2   : > { %1691 = vst [vmem:[%s2296_s8] sm:$0xff] %v1682_v58 }
 0x5f3   : > { %1693 = vst [vmem:[%s2296_s8 + $0x10] sm:$0xff] %v1687_v8 }
 0x5f7   : > { %v1683_v41 = vpop.f32.mrf.mxu0  ;;  %v1688_v44 = vpop.f32.mrf.mxu1 }
 0x5f8   : > { %v1684_v50 = vadd.f32 %v1683_v41, %v1643_v33  ;;  %v1689_v30 = vadd.f32 %v1688_v44, %v1653_v27 }
 0x5fa   : > { %1692 = vst [vmem:[%s2296_s8 + $0x8] sm:$0xff] %v1684_v50  ;;  %v1695_v25 = vadd.f32 %v1684_v50, %v1682_v58 }
 0x5fb   : > { %1694 = vst [vmem:[%s2296_s8 + $0x18] sm:$0xff] %v1689_v30 }
 0x5fc   : > { %v1696_v37 = vadd.f32 %v1695_v25, %v1687_v8 }
 0x5fe   : > { %v1697_v38 = vadd.f32 %v1696_v37, %v1689_v30 }
 0x600   : > { %v1698_v3 = vrot.slane %v1697_v38, 4 }
 0x602   : > { %v1699_v5 = vadd.f32 %v1698_v3, %v1697_v38 }
 0x604   : > { %v1700_v4 = vrot.slane %v1699_v5, 2 }
 0x606   : > { %v1701_v52 = vadd.f32 %v1700_v4, %v1699_v5 }
 0x608   : > { %v1702_v0 = vrot.slane %v1701_v52, 1 }
 0x60a   : > { %v1703_v14 = vadd.f32 %v1702_v0, %v1701_v52 }
 0x60c   : > { %v1711_v15 = vmul.f32 %v1710_v1, %v1703_v14 }
 0x60e   : > { %1712 = vst [vmem:[%s247_s9] sm:$0x1] %v1711_v15 }
 0x60f PF: > { %1723 = sbr.rel (!%p2264_p6) target bundleno = 1560 (0x618), region = 52  ;;  %v1761_v11 = vld [vmem:[%s2296_s8] sm:$0xff] (%p2264_p6)  ;;  %v1763_v57 = vld [vmem:[%s2296_s8 + $0x8] sm:$0xff] (%p2264_p6)  ;;  %v1765_v7 = vld [vmem:[%s2296_s8 + $0x10] sm:$0xff] (%p2264_p6) }
 0x610   : > { %s1724_s26 = smul.u32 (%p2264_p6), %s2149_s21, %s2153_s22  ;;  %v1767_v23 = vld [vmem:[%s2296_s8 + $0x18] sm:$0xff] (%p2264_p6) }
 0x612   : > { %s1919_s27 = sshll.u32 (%p2264_p6), %s1724_s26, 3 }
 0x613   : > { %s1726_s16 = scalar_lea.vmem (%p2264_p6), %s3294_s4, %s1919_s27 }
 0x614   : > { %1762 = vst [vmem:[%s1726_s16] sm:$0xff] %v1761_v11 }
 0x615   : > { %1764 = vst [vmem:[%s1726_s16 + $0x10] sm:$0xff] %v1763_v57 }
 0x616   : > { %1766 = vst [vmem:[%s1726_s16 + $0x20] sm:$0xff] %v1765_v7 }
 0x617   : > { %1768 = vst [vmem:[%s1726_s16 + $0x30] sm:$0xff] %v1767_v23 }
 0x618 PF: > { %s1775_s13 = smul.u32 %s2149_s21, %s2153_s22  ;;  %s1780_s14 = sshll.u32 %s247_s9, 4  ;;  %s1781_s14 = int_to_ptr.vmem [resolvable:$true] %s1780_s14 }
 0x619   : > { %s2091_s21 = scalar_lea.hbm %s3295_s5, 2 }
 0x61a   : > { %s1778_s17 = scalar_lea.hbm %s3295_s5, %s1775_s13 }
 0x61b   : > { %s1782_s27 = sshll.u32 %s1778_s17, 4  ;;  %s1783_s27 = int_to_ptr.hbm [resolvable:$true] %s1782_s27 }
 0x61c   : > { %s2085_s10 = sshra.s32 %s1783_s27, 4  ;;  %s2086_s10 = int_to_ptr.hbm [resolvable:$true] %s2085_s10 }
 0x61d   : > { %s2087_s8 = scalar_lea.hbm %s2086_s10, 1  ;;  %p2092_p9 = scmp.lt.s32.totalorder %s2086_s10, %s3295_s5 }
 0x61e   : > { %p2088_p4 = scmp.ne.s32.totalorder %s2086_s10, %s2087_s8  ;;  %p2093_p10 = scmp.lt.s32.totalorder %s2091_s21, %s2087_s8 }
 0x620   : > { %p2089_p5 = pnand %p2088_p4, %p2264_p6  ;;  %p2094_p11 = por %p2093_p10, %p2092_p9 }
 0x622   : > { %p2090_p7 = pneg %p2089_p5 }
 0x624   : > { %p2095_p12 = pnand %p2094_p11, %p2090_p7 }
 0x626   : > { %2098 = shalt.err (!%p2095_p12)
}
 0x627   : > { %s3415_s17 = scalar_lea.sflag [#allocation7], %s2283_s12 }
 0x628   : > { %1946 = dma.vmem_to_hbm [thread:$0]  (%p2264_p6), %s1781_s14, 16, %s1783_s27, %s3415_s17  }
 0x629 PF: > { %p1952_p13 = scmp.ge.s32.totalorder %s2165_s25, 2  ;;  %s1801_s13 = sand.u32 1, %s2137_s18  }
 0x62a   : > { %s1802_s15 = scalar_lea.sflag [#allocation7], %s1801_s13 }
 0x62b   : > { %p1949_p0 = pnand %p1952_p13, %p2271_p8 }
 0x62d   : > { %p1950_p1 = pneg %p1949_p0 }
 0x62f   : > { %2132 = dma.done.wait (%p1950_p1), %s1802_s15, 16  }
 0x630   : > { %2134 = vsyncadd (%p1950_p1), %s1802_s15, 4294967280  ;;  %s19_s25 = sadd.s32 1, %s2165_s25   ;;  %s3416_s18 = smov %s2141_s19 }
 0x631   : > { %p16_p2 = scmp.ge.s32.totalorder %s19_s25, 6   ;;  %s3417_s19 = smov %s2145_s20 }
 0x632   : > { %s3418_s20 = smov %s2280_s11  ;;  %s3419_s21 = smov %s2157_s23 }
 0x633   : > { %s3420_s22 = smov %s2161_s24  ;;  %s3421_s23 = smov %s3424_s28 }
 0x634   : > { %s3422_s24 = smov %s3428_s29  ;;  %18 = sbr.rel (!%p16_p2) target bundleno = 5 (0x5), region = 135 }
 0x639   :  { %1807 = vsyncpa [#allocation7], 1 }
 0x63a   :  { %1809 = vsyncpa [#allocation7 + $0x1], 1 }

</bundles_post_ra>
